<compile_context>
chip_gen: v7x
topology: tpu7x:2x2x1
jax: 0.10.0
libtpu: 0.0.40
codegen_flags: <defaults>
</compile_context>

<pallas_src>
import functools

import numpy as np

import jax
import jax.numpy as jnp
from jax.experimental import pallas as pl
from jax.experimental.pallas import tpu as pltpu

LN_EPS = 1e-5  # torch.nn.LayerNorm default

# Switch to jnp.bfloat16 at production KWT dims (keep preferred_element_type
# f32 for accumulation); f32 here preserves the toy-config tolerance.
_MM_DTYPE = jnp.float32


# ----------------------------------------------------------------------------
# in-kernel math helpers
# ----------------------------------------------------------------------------
def _mm(a, b):
    """2-D matmul on the MXU with f32 accumulation."""
    return jnp.dot(a.astype(_MM_DTYPE), b.astype(_MM_DTYPE),
                   preferred_element_type=jnp.float32)


def _layernorm(x, g, b):
    m = jnp.mean(x, axis=-1, keepdims=True)
    c = x - m
    v = jnp.mean(c * c, axis=-1, keepdims=True)
    return c * jax.lax.rsqrt(v + LN_EPS) * g + b


def _gelu(x):
    # exact (erf) GELU; rational erf approx (XLA/Eigen f32 coefficients) with
    # the 0.5 GELU scale folded into the numerator polynomial and the final
    # division moved to an EUP reciprocal.
    t = jnp.clip(x * 0.7071067811865475, -4.0, 4.0)
    t2 = t * t
    p = t2 * (-1.36307112900653e-10) + 1.38534071247951e-08
    p = t2 * p + (-1.05051201041254e-06)
    p = t2 * p + (-2.84625319731173e-05)
    p = t2 * p + (-3.67495315163428e-04)
    p = t2 * p + (-1.47729990427013e-03)
    p = t2 * p + (-8.04801666312075e-03)
    p = t * p
    q = t2 * (-1.45660718464996e-05) + (-2.13374055278905e-04)
    q = t2 * q + (-1.68282697438203e-03)
    q = t2 * q + (-7.37332916720468e-03)
    q = t2 * q + (-1.42647390514189e-02)
    half_erf = p * pl.reciprocal(q, approx=False)
    return x * (0.5 + half_erf)


# ----------------------------------------------------------------------------
# the fused kernel: grid axis = transformer depth
# ----------------------------------------------------------------------------
def _kwt_kernel(
    xp_ref, pe_w_ref, pe_b_ref, cls_ref, pos_ref, abias_ref, pool_ref,
    ln1g_ref, ln1b_ref, wqkv_ref, wo_ref, bo_ref,
    ln2g_ref, ln2b_ref, w1_ref, b1_ref, w2_ref, b2_ref,
    hg_ref, hb_ref, hw_ref, hbias_ref,
    o_ref, x_sc,
    *, B, N, S, S_pad, D, heads, dim_head, scale,
):
    l = pl.program_id(0)
    dh = dim_head
    inner = heads * dh

    # ---- grid step 0: patch-embed linear + cls/pos (one-time) ----
    @pl.when(l == 0)
    def _embed():
        tok = _mm(xp_ref[...], pe_w_ref[...]) + pe_b_ref[...]           # (B*N, D)
        pos = pos_ref[...]                                              # (S, D)
        cls_row = cls_ref[...] + pos[0:1, :]                            # (1, D)
        pos_tok = pos[1:, :]                                            # (N, D)
        zpad = jnp.zeros((S_pad - S, D), jnp.float32)
        pieces = []
        for b in range(B):                                              # one-time assembly
            pieces.append(cls_row)
            pieces.append(tok[b * N:(b + 1) * N, :] + pos_tok)
            pieces.append(zpad)
        x_sc[...] = jnp.concatenate(pieces, axis=0)                     # (B*S_pad, D)
        # emb dropout: identity (p=0.0 / eval)

    # ---- transformer layer `l` (weights streamed via BlockSpec index_map) ----
    x = x_sc[...]                                                       # (B*S_pad, D)

    # PreNorm(Attention)
    h = _layernorm(x, ln1g_ref[0], ln1b_ref[0])
    qkv = _mm(h, wqkv_ref[0])                                           # (B*S_pad, 3*inner)
    abias = abias_ref[...]                                              # (BS, BS) additive mask

    heads_out = []
    for hd in range(heads):
        q = qkv[:, hd * dh:(hd + 1) * dh]
        k = qkv[:, inner + hd * dh:inner + (hd + 1) * dh]
        v = qkv[:, 2 * inner + hd * dh:2 * inner + (hd + 1) * dh]
        s = jax.lax.dot_general(
            q.astype(_MM_DTYPE), k.astype(_MM_DTYPE),
            (((1,), (1,)), ((), ())),
            preferred_element_type=jnp.float32) * scale + abias          # (BS, BS)
        s = s - jnp.max(s, axis=-1, keepdims=True)
        e = jnp.exp(s)
        p_att = e * pl.reciprocal(jnp.sum(e, axis=-1, keepdims=True), approx=True)
        heads_out.append(_mm(p_att, v))                                  # (BS, dh)
    attn = _mm(jnp.concatenate(heads_out, axis=-1), wo_ref[0]) + bo_ref[0]   # (BS, D)
    # NO residual add: reproduces the isinstance(class, PreNorm)==False branch.

    # PreNorm(FeedForward)
    h2 = _layernorm(attn, ln2g_ref[0], ln2b_ref[0])
    f = _gelu(_mm(h2, w1_ref[0]) + b1_ref[0])                           # (BS, mlp)
    x_new = _mm(f, w2_ref[0]) + b2_ref[0]                               # (BS, D)
    x_sc[...] = x_new
    # NO residual add (same reproduced behaviour).

    # ---- last grid step: pooling + classification head ----
    @pl.when(l == pl.num_programs(0) - 1)
    def _head():
        pooled = _mm(pool_ref[...], x_new)                              # (B, D)
        ph = _layernorm(pooled, hg_ref[...], hb_ref[...])
        o_ref[...] = _mm(ph, hw_ref[...]) + hbias_ref[...]              # (B, classes)


# ----------------------------------------------------------------------------
# wrapper
# ----------------------------------------------------------------------------
def kwt_forward(params, x, cfg):
    B, C, H, W = x.shape
    p1, p2 = cfg["patch_res"]
    hh, ww = H // p1, W // p2
    N = hh * ww
    S = N + 1
    S_pad = ((S + 7) // 8) * 8          # 8-aligned padded sequence length
    BS = B * S_pad
    D = cfg["dim"]
    heads, dh = cfg["heads"], cfg["dim_head"]
    depth = cfg["depth"]
    num_classes = cfg["num_classes"]
    patch_dim = C * p1 * p2

    # glue: 'b c (h p1) (w p2) -> b (h w) (p1 p2 c)'  (pure reshape/transpose)
    xp = (x.reshape(B, C, hh, p1, ww, p2)
           .transpose(0, 2, 4, 3, 5, 1)
           .reshape(B * N, patch_dim))

    # additive attention bias: query i may attend key j iff same batch block
    # and j is a real (non-pad) token.
    abias_np = np.full((BS, BS), -1e30, dtype=np.float32)
    for b in range(B):
        abias_np[b * S_pad:(b + 1) * S_pad, b * S_pad:b * S_pad + S] = 0.0
    abias = jnp.asarray(abias_np)

    # pooling as a tiny selection / averaging matmul over the padded slab
    pool_np = np.zeros((B, BS), dtype=np.float32)
    for b in range(B):
        if cfg["pool"] == "mean":
            pool_np[b, b * S_pad:b * S_pad + S] = 1.0 / S
        else:  # 'cls'
            pool_np[b, b * S_pad] = 1.0
    pool_mat = jnp.asarray(pool_np)

    kern = functools.partial(
        _kwt_kernel, B=B, N=N, S=S, S_pad=S_pad, D=D, heads=heads,
        dim_head=dh, scale=float(dh) ** -0.5)

    def const_spec(a):
        nd = a.ndim
        return pl.BlockSpec(tuple(a.shape), lambda l, nd=nd: (0,) * nd)

    def layer_spec(a):
        nd = a.ndim
        return pl.BlockSpec((1,) + tuple(a.shape[1:]),
                            lambda l, nd=nd: (l,) + (0,) * (nd - 1))

    const_in = (xp, params["pe_w"], params["pe_b"], params["cls_token"],
                params["pos_embedding"], abias, pool_mat)
    layer_in = (params["ln1_g"], params["ln1_b"], params["wqkv"], params["wo"],
                params["bo"], params["ln2_g"], params["ln2_b"], params["w1"],
                params["b1"], params["w2"], params["b2"])
    tail_in = (params["head_g"], params["head_b"], params["head_w"],
               params["head_bias"])

    in_specs = ([const_spec(a) for a in const_in]
                + [layer_spec(a) for a in layer_in]
                + [const_spec(a) for a in tail_in])

    return pl.pallas_call(
        kern,
        out_shape=jax.ShapeDtypeStruct((B, num_classes), jnp.float32),
        grid=(depth,),
        in_specs=in_specs,
        out_specs=pl.BlockSpec((B, num_classes), lambda l: (0, 0)),
        scratch_shapes=[pltpu.VMEM((BS, D), jnp.float32)],
        compiler_params=pltpu.CompilerParams(
            dimension_semantics=("arbitrary",),
            vmem_limit_bytes=32 * 1024 * 1024),
    )(*const_in, *layer_in, *tail_in)


# ----------------------------------------------------------------------------
# parameter init (per-layer weights stacked on a leading depth axis;
# QKV / output-projection weights stored pre-fused)
# ----------------------------------------------------------------------------
def init_params(key, cfg):
    D, heads, dh, mlp, L = (
        cfg["dim"], cfg["heads"], cfg["dim_head"], cfg["mlp_dim"], cfg["depth"]
    )
    p1, p2 = cfg["patch_res"]
    C = cfg["channels"]
    H, W = cfg["input_res"]
    N = (H // p1) * (W // p2)
    S = N + 1
    patch_dim = C * p1 * p2

    keys = iter(jax.random.split(key, 32))
    nrm = lambda shp, s: (s * jax.random.normal(next(keys), shp)).astype(jnp.float32)

    return {
        "pe_w": nrm((patch_dim, D), 0.2),
        "pe_b": nrm((1, D), 0.02),
        "cls_token": nrm((1, D), 1.0),
        "pos_embedding": nrm((S, D), 1.0),
        # per-layer (stacked over depth L); QKV columns ordered
        # [q_h0..q_h{H-1}, k_h0.., v_h0..] exactly like nn.Linear(dim, 3*inner)
        "ln1_g": jnp.ones((L, 1, D), jnp.float32),
        "ln1_b": jnp.zeros((L, 1, D), jnp.float32),
        "wqkv": nrm((L, D, 3 * heads * dh), 0.2),
        "wo": nrm((L, heads * dh, D), 0.2),
        "bo": nrm((L, 1, D), 0.02),
        "ln2_g": jnp.ones((L, 1, D), jnp.float32),
        "ln2_b": jnp.zeros((L, 1, D), jnp.float32),
        "w1": nrm((L, D, mlp), 0.2),
        "b1": nrm((L, 1, mlp), 0.02),
        "w2": nrm((L, mlp, D), 0.2),
        "b2": nrm((L, 1, D), 0.02),
        # head
        "head_g": jnp.ones((1, D), jnp.float32),
        "head_b": jnp.zeros((1, D), jnp.float32),
        "head_w": nrm((D, cfg["num_classes"]), 0.2),
        "head_bias": nrm((1, cfg["num_classes"]), 0.02),
    }


# ----------------------------------------------------------------------------
# pure-JAX reference (exact math, no Pallas) for correctness check
# ----------------------------------------------------------------------------
def _ref_ln(x, g, b):
    m = jnp.mean(x, axis=-1, keepdims=True)
    c = x - m
    v = jnp.mean(c * c, axis=-1, keepdims=True)
    return c / jnp.sqrt(v + LN_EPS) * g + b


def kwt_reference(params, x, cfg):
    B, C, H, W = x.shape
    p1, p2 = cfg["patch_res"]
    hh, ww = H // p1, W // p2
    N = hh * ww
    D = cfg["dim"]
    heads, dh = cfg["heads"], cfg["dim_head"]
    scale = float(dh) ** -0.5
    S = N + 1

    xp = (x.reshape(B, C, hh, p1, ww, p2)
           .transpose(0, 2, 4, 3, 5, 1)
           .reshape(B, N, p1 * p2 * C))
    tok = xp @ params["pe_w"] + params["pe_b"][0]
    cls = jnp.broadcast_to(params["cls_token"][None], (B, 1, D))
    z = jnp.concatenate([cls, tok], axis=1) + params["pos_embedding"][None]

    for l in range(cfg["depth"]):
        h = _ref_ln(z, params["ln1_g"][l, 0], params["ln1_b"][l, 0])
        qkv = h @ params["wqkv"][l]                                   # (B,S,3*H*dh)
        inner = heads * dh
        q = qkv[..., :inner].reshape(B, S, heads, dh).transpose(0, 2, 1, 3)
        k = qkv[..., inner:2 * inner].reshape(B, S, heads, dh).transpose(0, 2, 1, 3)
        v = qkv[..., 2 * inner:].reshape(B, S, heads, dh).transpose(0, 2, 1, 3)
        dots = jnp.einsum("bhid,bhjd->bhij", q, k) * scale
        attn = jax.nn.softmax(dots, axis=-1)
        o = jnp.einsum("bhij,bhjd->bhid", attn, v)
        o = o.transpose(0, 2, 1, 3).reshape(B, S, inner)
        out = o @ params["wo"][l] + params["bo"][l, 0]
        # no residual (reproduces isinstance(class, PreNorm)==False branch)
        h2 = _ref_ln(out, params["ln2_g"][l, 0], params["ln2_b"][l, 0])
        f = h2 @ params["w1"][l] + params["b1"][l, 0]
        f = 0.5 * f * (1.0 + jax.scipy.special.erf(f / jnp.sqrt(2.0)))
        z = f @ params["w2"][l] + params["b2"][l, 0]
        # no residual

    pooled = jnp.mean(z, axis=1) if cfg["pool"] == "mean" else z[:, 0]
    pooled = _ref_ln(pooled, params["head_g"][0], params["head_b"][0])
    return pooled @ params["head_w"] + params["head_bias"][0]


# ----------------------------------------------------------------------------
if __name__ == "__main__":
    cfg = dict(
        input_res=(16, 16), patch_res=(4, 4), num_classes=10, dim=32,
        depth=2, heads=4, mlp_dim=64, pool="cls", channels=1, dim_head=8,
    )
    key = jax.random.PRNGKey(0)
    kp, kx = jax.random.split(key)
    params = init_params(kp, cfg)
    x = jax.random.normal(kx, (2, cfg["channels"], *cfg["input_res"]), dtype=jnp.float32)

    fwd = jax.jit(functools.partial(kwt_forward, cfg=cfg))
    logits = jax.block_until_ready(fwd(params, x))
    ref = jax.block_until_ready(kwt_reference(params, x, cfg))

    assert logits.shape == (2, cfg["num_classes"]), logits.shape
    max_diff = float(jnp.max(jnp.abs(logits - ref)))
    # 5e-3 tolerance: approx-reciprocal softmax (EUP) vs exact-division reference.
    assert max_diff < 5e-3, f"mismatch vs reference: {max_diff}"
    # TODO(synk): mask-embedding assignment (x[mask] = mask_embedding) is skipped since mask=None.
    print("KERNEL_OK")
</pallas_src>

<mosaic_0001>
module attributes {stable_mosaic.version = 11 : i64} {
  func.func @_kwt_kernel(%arg0: i32, %arg1: memref<32x16xf32, #tpu.memory_space<vmem>>, %arg2: memref<16x32xf32, #tpu.memory_space<vmem>>, %arg3: memref<1x32xf32, #tpu.memory_space<vmem>>, %arg4: memref<1x32xf32, #tpu.memory_space<vmem>>, %arg5: memref<17x32xf32, #tpu.memory_space<vmem>>, %arg6: memref<48x48xf32, #tpu.memory_space<vmem>>, %arg7: memref<2x48xf32, #tpu.memory_space<vmem>>, %arg8: memref<1x1x32xf32, #tpu.memory_space<vmem>>, %arg9: memref<1x1x32xf32, #tpu.memory_space<vmem>>, %arg10: memref<1x32x96xf32, #tpu.memory_space<vmem>>, %arg11: memref<1x32x32xf32, #tpu.memory_space<vmem>>, %arg12: memref<1x1x32xf32, #tpu.memory_space<vmem>>, %arg13: memref<1x1x32xf32, #tpu.memory_space<vmem>>, %arg14: memref<1x1x32xf32, #tpu.memory_space<vmem>>, %arg15: memref<1x32x64xf32, #tpu.memory_space<vmem>>, %arg16: memref<1x1x64xf32, #tpu.memory_space<vmem>>, %arg17: memref<1x64x32xf32, #tpu.memory_space<vmem>>, %arg18: memref<1x1x32xf32, #tpu.memory_space<vmem>>, %arg19: memref<1x32xf32, #tpu.memory_space<vmem>>, %arg20: memref<1x32xf32, #tpu.memory_space<vmem>>, %arg21: memref<32x10xf32, #tpu.memory_space<vmem>>, %arg22: memref<1x10xf32, #tpu.memory_space<vmem>>, %arg23: memref<2x10xf32, #tpu.memory_space<vmem>>, %arg24: memref<48x32xf32, #tpu.memory_space<vmem>>) attributes {dimension_semantics = [#tpu.dimension_semantics<arbitrary>], iteration_bounds = array<i64: 2>, scalar_prefetch = 0 : i64, scratch_operands = 1 : i64, tpu.core_type = #tpu.core_type<tc>, window_params = [{pipeline_mode = #tpu.pipeline_mode<synchronous>, transform_indices = @transform_0, window_bounds = array<i64: 32, 16>}, {pipeline_mode = #tpu.pipeline_mode<synchronous>, transform_indices = @transform_1, window_bounds = array<i64: 16, 32>}, {pipeline_mode = #tpu.pipeline_mode<synchronous>, transform_indices = @transform_2, window_bounds = array<i64: 1, 32>}, {pipeline_mode = #tpu.pipeline_mode<synchronous>, transform_indices = @transform_3, window_bounds = array<i64: 1, 32>}, {pipeline_mode = #tpu.pipeline_mode<synchronous>, transform_indices = @transform_4, window_bounds = array<i64: 17, 32>}, {pipeline_mode = #tpu.pipeline_mode<synchronous>, transform_indices = @transform_5, window_bounds = array<i64: 48, 48>}, {pipeline_mode = #tpu.pipeline_mode<synchronous>, transform_indices = @transform_6, window_bounds = array<i64: 2, 48>}, {transform_indices = @transform_7, window_bounds = array<i64: 1, 1, 32>}, {transform_indices = @transform_8, window_bounds = array<i64: 1, 1, 32>}, {transform_indices = @transform_9, window_bounds = array<i64: 1, 32, 96>}, {transform_indices = @transform_10, window_bounds = array<i64: 1, 32, 32>}, {transform_indices = @transform_11, window_bounds = array<i64: 1, 1, 32>}, {transform_indices = @transform_12, window_bounds = array<i64: 1, 1, 32>}, {transform_indices = @transform_13, window_bounds = array<i64: 1, 1, 32>}, {transform_indices = @transform_14, window_bounds = array<i64: 1, 32, 64>}, {transform_indices = @transform_15, window_bounds = array<i64: 1, 1, 64>}, {transform_indices = @transform_16, window_bounds = array<i64: 1, 64, 32>}, {transform_indices = @transform_17, window_bounds = array<i64: 1, 1, 32>}, {pipeline_mode = #tpu.pipeline_mode<synchronous>, transform_indices = @transform_18, window_bounds = array<i64: 1, 32>}, {pipeline_mode = #tpu.pipeline_mode<synchronous>, transform_indices = @transform_19, window_bounds = array<i64: 1, 32>}, {pipeline_mode = #tpu.pipeline_mode<synchronous>, transform_indices = @transform_20, window_bounds = array<i64: 32, 10>}, {pipeline_mode = #tpu.pipeline_mode<synchronous>, transform_indices = @transform_21, window_bounds = array<i64: 1, 10>}, {pipeline_mode = #tpu.pipeline_mode<synchronous>, transform_indices = @transform_22, window_bounds = array<i64: 2, 10>}]} {
    %c0_i32 = arith.constant 0 : i32
    %0 = arith.cmpi eq, %arg0, %c0_i32 : i32
    %1 = arith.extui %0 : i1 to i32
    %c0_i32_0 = arith.constant 0 : i32
    %2 = arith.cmpi ne, %1, %c0_i32_0 : i32
    scf.if %2 {
      %c0_89 = arith.constant 0 : index
      %c0_90 = arith.constant 0 : index
      %199 = vector.load %arg1[%c0_89, %c0_90] : memref<32x16xf32, #tpu.memory_space<vmem>>, vector<32x16xf32>
      %c0_91 = arith.constant 0 : index
      %c0_92 = arith.constant 0 : index
      %200 = vector.load %arg2[%c0_91, %c0_92] : memref<16x32xf32, #tpu.memory_space<vmem>>, vector<16x32xf32>
      %cst_93 = arith.constant dense<0.000000e+00> : vector<32x32xf32>
      %201 = tpu.matmul %199, %200, %cst_93 {dimension_numbers = #tpu.dot_dimension_numbers<[1], [0], [0], [1], [0, 0, 1, 1], [], []>} : vector<32x16xf32>, vector<16x32xf32>, vector<32x32xf32> -> vector<32x32xf32>
      %c0_94 = arith.constant 0 : index
      %c0_95 = arith.constant 0 : index
      %202 = vector.load %arg3[%c0_94, %c0_95] : memref<1x32xf32, #tpu.memory_space<vmem>>, vector<1x32xf32>
      %203 = vector.broadcast %202 : vector<1x32xf32> to vector<32x32xf32>
      %204 = arith.addf %201, %203 : vector<32x32xf32>
      %c0_96 = arith.constant 0 : index
      %c0_97 = arith.constant 0 : index
      %205 = vector.load %arg5[%c0_96, %c0_97] : memref<17x32xf32, #tpu.memory_space<vmem>>, vector<17x32xf32>
      %c0_98 = arith.constant 0 : index
      %c0_99 = arith.constant 0 : index
      %206 = vector.load %arg4[%c0_98, %c0_99] : memref<1x32xf32, #tpu.memory_space<vmem>>, vector<1x32xf32>
      %207 = vector.extract_strided_slice %205 {offsets = [0, 0], sizes = [1, 32], strides = [1, 1]} : vector<17x32xf32> to vector<1x32xf32>
      %208 = arith.addf %206, %207 : vector<1x32xf32>
      %209 = vector.extract_strided_slice %205 {offsets = [1, 0], sizes = [16, 32], strides = [1, 1]} : vector<17x32xf32> to vector<16x32xf32>
      %cst_100 = arith.constant 0.000000e+00 : f32
      %210 = vector.broadcast %cst_100 : f32 to vector<7x32xf32>
      %211 = vector.extract_strided_slice %204 {offsets = [0, 0], sizes = [16, 32], strides = [1, 1]} : vector<32x32xf32> to vector<16x32xf32>
      %212 = arith.addf %211, %209 : vector<16x32xf32>
      %213 = vector.extract_strided_slice %204 {offsets = [16, 0], sizes = [16, 32], strides = [1, 1]} : vector<32x32xf32> to vector<16x32xf32>
      %214 = arith.addf %213, %209 : vector<16x32xf32>
      %215 = tpu.concatenate %208, %212, %210, %208, %214, %210 in 0 : vector<1x32xf32>, vector<16x32xf32>, vector<7x32xf32>, vector<1x32xf32>, vector<16x32xf32>, vector<7x32xf32> -> vector<48x32xf32>
      %c0_101 = arith.constant 0 : index
      %c0_102 = arith.constant 0 : index
      %216 = vector.load %arg24[%c0_101, %c0_102] : memref<48x32xf32, #tpu.memory_space<vmem>>, vector<48x32xf32>
      tpu.vector_store %arg24[%c0_101, %c0_102], %215 {strides = array<i32>} : memref<48x32xf32, #tpu.memory_space<vmem>>, vector<48x32xf32>,
    } else {
    }
    %c0 = arith.constant 0 : index
    %c0_1 = arith.constant 0 : index
    %3 = vector.load %arg24[%c0, %c0_1] : memref<48x32xf32, #tpu.memory_space<vmem>>, vector<48x32xf32>
    %c0_2 = arith.constant 0 : index
    %c0_3 = arith.constant 0 : index
    %c0_4 = arith.constant 0 : index
    %4 = vector.load %arg8[%c0_2, %c0_3, %c0_4] : memref<1x1x32xf32, #tpu.memory_space<vmem>>, vector<1x1x32xf32>
    %5 = vector.shape_cast %4 : vector<1x1x32xf32> to vector<1x32xf32>
    %c0_5 = arith.constant 0 : index
    %c0_6 = arith.constant 0 : index
    %c0_7 = arith.constant 0 : index
    %6 = vector.load %arg9[%c0_5, %c0_6, %c0_7] : memref<1x1x32xf32, #tpu.memory_space<vmem>>, vector<1x1x32xf32>
    %7 = vector.shape_cast %6 : vector<1x1x32xf32> to vector<1x32xf32>
    %cst = arith.constant dense<0.000000e+00> : vector<48xf32>
    %8 = vector.multi_reduction <add>, %3, %cst [1] : vector<48x32xf32> to vector<48xf32>
    %9 = vector.shape_cast %8 : vector<48xf32> to vector<48x1xf32>
    %cst_8 = arith.constant 3.200000e+01 : f32
    %10 = vector.broadcast %cst_8 : f32 to vector<48x1xf32>
    %11 = arith.divf %9, %10 : vector<48x1xf32>
    %12 = vector.broadcast %11 : vector<48x1xf32> to vector<48x32xf32>
    %13 = arith.subf %3, %12 : vector<48x32xf32>
    %14 = arith.mulf %13, %13 : vector<48x32xf32>
    %cst_9 = arith.constant dense<0.000000e+00> : vector<48xf32>
    %15 = vector.multi_reduction <add>, %14, %cst_9 [1] : vector<48x32xf32> to vector<48xf32>
    %16 = vector.shape_cast %15 : vector<48xf32> to vector<48x1xf32>
    %cst_10 = arith.constant 3.200000e+01 : f32
    %17 = vector.broadcast %cst_10 : f32 to vector<48x1xf32>
    %18 = arith.divf %16, %17 : vector<48x1xf32>
    %cst_11 = arith.constant 9.99999974E-6 : f32
    %19 = vector.broadcast %cst_11 : f32 to vector<48x1xf32>
    %20 = arith.addf %18, %19 : vector<48x1xf32>
    %21 = math.rsqrt %20 : vector<48x1xf32>
    %22 = vector.broadcast %21 : vector<48x1xf32> to vector<48x32xf32>
    %23 = arith.mulf %13, %22 : vector<48x32xf32>
    %24 = vector.broadcast %5 : vector<1x32xf32> to vector<48x32xf32>
    %25 = arith.mulf %23, %24 : vector<48x32xf32>
    %26 = vector.broadcast %7 : vector<1x32xf32> to vector<48x32xf32>
    %27 = arith.addf %25, %26 : vector<48x32xf32>
    %c0_12 = arith.constant 0 : index
    %c0_13 = arith.constant 0 : index
    %c0_14 = arith.constant 0 : index
    %28 = vector.load %arg10[%c0_12, %c0_13, %c0_14] : memref<1x32x96xf32, #tpu.memory_space<vmem>>, vector<1x32x96xf32>
    %29 = vector.shape_cast %28 : vector<1x32x96xf32> to vector<32x96xf32>
    %cst_15 = arith.constant dense<0.000000e+00> : vector<48x96xf32>
    %30 = tpu.matmul %27, %29, %cst_15 {dimension_numbers = #tpu.dot_dimension_numbers<[1], [0], [0], [1], [0, 0, 1, 1], [], []>} : vector<48x32xf32>, vector<32x96xf32>, vector<48x96xf32> -> vector<48x96xf32>
    %c0_16 = arith.constant 0 : index
    %c0_17 = arith.constant 0 : index
    %31 = vector.load %arg6[%c0_16, %c0_17] : memref<48x48xf32, #tpu.memory_space<vmem>>, vector<48x48xf32>
    %32 = vector.extract_strided_slice %30 {offsets = [0, 0], sizes = [48, 8], strides = [1, 1]} : vector<48x96xf32> to vector<48x8xf32>
    %33 = vector.extract_strided_slice %30 {offsets = [0, 32], sizes = [48, 8], strides = [1, 1]} : vector<48x96xf32> to vector<48x8xf32>
    %34 = vector.extract_strided_slice %30 {offsets = [0, 64], sizes = [48, 8], strides = [1, 1]} : vector<48x96xf32> to vector<48x8xf32>
    %cst_18 = arith.constant dense<0.000000e+00> : vector<48x48xf32>
    %35 = tpu.matmul %32, %33, %cst_18 {dimension_numbers = #tpu.dot_dimension_numbers<[1], [1], [0], [0], [0, 0, 1, 0], [], []>} : vector<48x8xf32>, vector<48x8xf32>, vector<48x48xf32> -> vector<48x48xf32>
    %cst_19 = arith.constant 0.353553385 : f32
    %36 = vector.broadcast %cst_19 : f32 to vector<48x48xf32>
    %37 = arith.mulf %35, %36 : vector<48x48xf32>
    %38 = arith.addf %37, %31 : vector<48x48xf32>
    %cst_20 = arith.constant dense<0xFF800000> : vector<48xf32>
    %39 = vector.multi_reduction <maximumf>, %38, %cst_20 [1] : vector<48x48xf32> to vector<48xf32>
    %40 = vector.shape_cast %39 : vector<48xf32> to vector<48x1xf32>
    %41 = vector.broadcast %40 : vector<48x1xf32> to vector<48x48xf32>
    %42 = arith.subf %38, %41 : vector<48x48xf32>
    %43 = math.exp %42 : vector<48x48xf32>
    %cst_21 = arith.constant dense<0.000000e+00> : vector<48xf32>
    %44 = vector.multi_reduction <add>, %43, %cst_21 [1] : vector<48x48xf32> to vector<48xf32>
    %45 = vector.shape_cast %44 : vector<48xf32> to vector<48x1xf32>
    %46 = tpu.reciprocal %45 {approx = true} : vector<48x1xf32> -> vector<48x1xf32>
    %47 = vector.broadcast %46 : vector<48x1xf32> to vector<48x48xf32>
    %48 = arith.mulf %43, %47 : vector<48x48xf32>
    %cst_22 = arith.constant dense<0.000000e+00> : vector<48x8xf32>
    %49 = tpu.matmul %48, %34, %cst_22 {dimension_numbers = #tpu.dot_dimension_numbers<[1], [0], [0], [1], [0, 0, 1, 1], [], []>} : vector<48x48xf32>, vector<48x8xf32>, vector<48x8xf32> -> vector<48x8xf32>
    %50 = vector.extract_strided_slice %30 {offsets = [0, 8], sizes = [48, 8], strides = [1, 1]} : vector<48x96xf32> to vector<48x8xf32>
    %51 = vector.extract_strided_slice %30 {offsets = [0, 40], sizes = [48, 8], strides = [1, 1]} : vector<48x96xf32> to vector<48x8xf32>
    %52 = vector.extract_strided_slice %30 {offsets = [0, 72], sizes = [48, 8], strides = [1, 1]} : vector<48x96xf32> to vector<48x8xf32>
    %cst_23 = arith.constant dense<0.000000e+00> : vector<48x48xf32>
    %53 = tpu.matmul %50, %51, %cst_23 {dimension_numbers = #tpu.dot_dimension_numbers<[1], [1], [0], [0], [0, 0, 1, 0], [], []>} : vector<48x8xf32>, vector<48x8xf32>, vector<48x48xf32> -> vector<48x48xf32>
    %cst_24 = arith.constant 0.353553385 : f32
    %54 = vector.broadcast %cst_24 : f32 to vector<48x48xf32>
    %55 = arith.mulf %53, %54 : vector<48x48xf32>
    %56 = arith.addf %55, %31 : vector<48x48xf32>
    %cst_25 = arith.constant dense<0xFF800000> : vector<48xf32>
    %57 = vector.multi_reduction <maximumf>, %56, %cst_25 [1] : vector<48x48xf32> to vector<48xf32>
    %58 = vector.shape_cast %57 : vector<48xf32> to vector<48x1xf32>
    %59 = vector.broadcast %58 : vector<48x1xf32> to vector<48x48xf32>
    %60 = arith.subf %56, %59 : vector<48x48xf32>
    %61 = math.exp %60 : vector<48x48xf32>
    %cst_26 = arith.constant dense<0.000000e+00> : vector<48xf32>
    %62 = vector.multi_reduction <add>, %61, %cst_26 [1] : vector<48x48xf32> to vector<48xf32>
    %63 = vector.shape_cast %62 : vector<48xf32> to vector<48x1xf32>
    %64 = tpu.reciprocal %63 {approx = true} : vector<48x1xf32> -> vector<48x1xf32>
    %65 = vector.broadcast %64 : vector<48x1xf32> to vector<48x48xf32>
    %66 = arith.mulf %61, %65 : vector<48x48xf32>
    %cst_27 = arith.constant dense<0.000000e+00> : vector<48x8xf32>
    %67 = tpu.matmul %66, %52, %cst_27 {dimension_numbers = #tpu.dot_dimension_numbers<[1], [0], [0], [1], [0, 0, 1, 1], [], []>} : vector<48x48xf32>, vector<48x8xf32>, vector<48x8xf32> -> vector<48x8xf32>
    %68 = vector.extract_strided_slice %30 {offsets = [0, 16], sizes = [48, 8], strides = [1, 1]} : vector<48x96xf32> to vector<48x8xf32>
    %69 = vector.extract_strided_slice %30 {offsets = [0, 48], sizes = [48, 8], strides = [1, 1]} : vector<48x96xf32> to vector<48x8xf32>
    %70 = vector.extract_strided_slice %30 {offsets = [0, 80], sizes = [48, 8], strides = [1, 1]} : vector<48x96xf32> to vector<48x8xf32>
    %cst_28 = arith.constant dense<0.000000e+00> : vector<48x48xf32>
    %71 = tpu.matmul %68, %69, %cst_28 {dimension_numbers = #tpu.dot_dimension_numbers<[1], [1], [0], [0], [0, 0, 1, 0], [], []>} : vector<48x8xf32>, vector<48x8xf32>, vector<48x48xf32> -> vector<48x48xf32>
    %cst_29 = arith.constant 0.353553385 : f32
    %72 = vector.broadcast %cst_29 : f32 to vector<48x48xf32>
    %73 = arith.mulf %71, %72 : vector<48x48xf32>
    %74 = arith.addf %73, %31 : vector<48x48xf32>
    %cst_30 = arith.constant dense<0xFF800000> : vector<48xf32>
    %75 = vector.multi_reduction <maximumf>, %74, %cst_30 [1] : vector<48x48xf32> to vector<48xf32>
    %76 = vector.shape_cast %75 : vector<48xf32> to vector<48x1xf32>
    %77 = vector.broadcast %76 : vector<48x1xf32> to vector<48x48xf32>
    %78 = arith.subf %74, %77 : vector<48x48xf32>
    %79 = math.exp %78 : vector<48x48xf32>
    %cst_31 = arith.constant dense<0.000000e+00> : vector<48xf32>
    %80 = vector.multi_reduction <add>, %79, %cst_31 [1] : vector<48x48xf32> to vector<48xf32>
    %81 = vector.shape_cast %80 : vector<48xf32> to vector<48x1xf32>
    %82 = tpu.reciprocal %81 {approx = true} : vector<48x1xf32> -> vector<48x1xf32>
    %83 = vector.broadcast %82 : vector<48x1xf32> to vector<48x48xf32>
    %84 = arith.mulf %79, %83 : vector<48x48xf32>
    %cst_32 = arith.constant dense<0.000000e+00> : vector<48x8xf32>
    %85 = tpu.matmul %84, %70, %cst_32 {dimension_numbers = #tpu.dot_dimension_numbers<[1], [0], [0], [1], [0, 0, 1, 1], [], []>} : vector<48x48xf32>, vector<48x8xf32>, vector<48x8xf32> -> vector<48x8xf32>
    %86 = vector.extract_strided_slice %30 {offsets = [0, 24], sizes = [48, 8], strides = [1, 1]} : vector<48x96xf32> to vector<48x8xf32>
    %87 = vector.extract_strided_slice %30 {offsets = [0, 56], sizes = [48, 8], strides = [1, 1]} : vector<48x96xf32> to vector<48x8xf32>
    %88 = vector.extract_strided_slice %30 {offsets = [0, 88], sizes = [48, 8], strides = [1, 1]} : vector<48x96xf32> to vector<48x8xf32>
    %cst_33 = arith.constant dense<0.000000e+00> : vector<48x48xf32>
    %89 = tpu.matmul %86, %87, %cst_33 {dimension_numbers = #tpu.dot_dimension_numbers<[1], [1], [0], [0], [0, 0, 1, 0], [], []>} : vector<48x8xf32>, vector<48x8xf32>, vector<48x48xf32> -> vector<48x48xf32>
    %cst_34 = arith.constant 0.353553385 : f32
    %90 = vector.broadcast %cst_34 : f32 to vector<48x48xf32>
    %91 = arith.mulf %89, %90 : vector<48x48xf32>
    %92 = arith.addf %91, %31 : vector<48x48xf32>
    %cst_35 = arith.constant dense<0xFF800000> : vector<48xf32>
    %93 = vector.multi_reduction <maximumf>, %92, %cst_35 [1] : vector<48x48xf32> to vector<48xf32>
    %94 = vector.shape_cast %93 : vector<48xf32> to vector<48x1xf32>
    %95 = vector.broadcast %94 : vector<48x1xf32> to vector<48x48xf32>
    %96 = arith.subf %92, %95 : vector<48x48xf32>
    %97 = math.exp %96 : vector<48x48xf32>
    %cst_36 = arith.constant dense<0.000000e+00> : vector<48xf32>
    %98 = vector.multi_reduction <add>, %97, %cst_36 [1] : vector<48x48xf32> to vector<48xf32>
    %99 = vector.shape_cast %98 : vector<48xf32> to vector<48x1xf32>
    %100 = tpu.reciprocal %99 {approx = true} : vector<48x1xf32> -> vector<48x1xf32>
    %101 = vector.broadcast %100 : vector<48x1xf32> to vector<48x48xf32>
    %102 = arith.mulf %97, %101 : vector<48x48xf32>
    %cst_37 = arith.constant dense<0.000000e+00> : vector<48x8xf32>
    %103 = tpu.matmul %102, %88, %cst_37 {dimension_numbers = #tpu.dot_dimension_numbers<[1], [0], [0], [1], [0, 0, 1, 1], [], []>} : vector<48x48xf32>, vector<48x8xf32>, vector<48x8xf32> -> vector<48x8xf32>
    %104 = tpu.concatenate %49, %67, %85, %103 in 1 : vector<48x8xf32>, vector<48x8xf32>, vector<48x8xf32>, vector<48x8xf32> -> vector<48x32xf32>
    %c0_38 = arith.constant 0 : index
    %c0_39 = arith.constant 0 : index
    %c0_40 = arith.constant 0 : index
    %105 = vector.load %arg11[%c0_38, %c0_39, %c0_40] : memref<1x32x32xf32, #tpu.memory_space<vmem>>, vector<1x32x32xf32>
    %106 = vector.shape_cast %105 : vector<1x32x32xf32> to vector<32x32xf32>
    %cst_41 = arith.constant dense<0.000000e+00> : vector<48x32xf32>
    %107 = tpu.matmul %104, %106, %cst_41 {dimension_numbers = #tpu.dot_dimension_numbers<[1], [0], [0], [1], [0, 0, 1, 1], [], []>} : vector<48x32xf32>, vector<32x32xf32>, vector<48x32xf32> -> vector<48x32xf32>
    %c0_42 = arith.constant 0 : index
    %c0_43 = arith.constant 0 : index
    %c0_44 = arith.constant 0 : index
    %108 = vector.load %arg12[%c0_42, %c0_43, %c0_44] : memref<1x1x32xf32, #tpu.memory_space<vmem>>, vector<1x1x32xf32>
    %109 = vector.shape_cast %108 : vector<1x1x32xf32> to vector<1x32xf32>
    %110 = vector.broadcast %109 : vector<1x32xf32> to vector<48x32xf32>
    %111 = arith.addf %107, %110 : vector<48x32xf32>
    %c0_45 = arith.constant 0 : index
    %c0_46 = arith.constant 0 : index
    %c0_47 = arith.constant 0 : index
    %112 = vector.load %arg13[%c0_45, %c0_46, %c0_47] : memref<1x1x32xf32, #tpu.memory_space<vmem>>, vector<1x1x32xf32>
    %113 = vector.shape_cast %112 : vector<1x1x32xf32> to vector<1x32xf32>
    %c0_48 = arith.constant 0 : index
    %c0_49 = arith.constant 0 : index
    %c0_50 = arith.constant 0 : index
    %114 = vector.load %arg14[%c0_48, %c0_49, %c0_50] : memref<1x1x32xf32, #tpu.memory_space<vmem>>, vector<1x1x32xf32>
    %115 = vector.shape_cast %114 : vector<1x1x32xf32> to vector<1x32xf32>
    %cst_51 = arith.constant dense<0.000000e+00> : vector<48xf32>
    %116 = vector.multi_reduction <add>, %111, %cst_51 [1] : vector<48x32xf32> to vector<48xf32>
    %117 = vector.shape_cast %116 : vector<48xf32> to vector<48x1xf32>
    %cst_52 = arith.constant 3.200000e+01 : f32
    %118 = vector.broadcast %cst_52 : f32 to vector<48x1xf32>
    %119 = arith.divf %117, %118 : vector<48x1xf32>
    %120 = vector.broadcast %119 : vector<48x1xf32> to vector<48x32xf32>
    %121 = arith.subf %111, %120 : vector<48x32xf32>
    %122 = arith.mulf %121, %121 : vector<48x32xf32>
    %cst_53 = arith.constant dense<0.000000e+00> : vector<48xf32>
    %123 = vector.multi_reduction <add>, %122, %cst_53 [1] : vector<48x32xf32> to vector<48xf32>
    %124 = vector.shape_cast %123 : vector<48xf32> to vector<48x1xf32>
    %cst_54 = arith.constant 3.200000e+01 : f32
    %125 = vector.broadcast %cst_54 : f32 to vector<48x1xf32>
    %126 = arith.divf %124, %125 : vector<48x1xf32>
    %cst_55 = arith.constant 9.99999974E-6 : f32
    %127 = vector.broadcast %cst_55 : f32 to vector<48x1xf32>
    %128 = arith.addf %126, %127 : vector<48x1xf32>
    %129 = math.rsqrt %128 : vector<48x1xf32>
    %130 = vector.broadcast %129 : vector<48x1xf32> to vector<48x32xf32>
    %131 = arith.mulf %121, %130 : vector<48x32xf32>
    %132 = vector.broadcast %113 : vector<1x32xf32> to vector<48x32xf32>
    %133 = arith.mulf %131, %132 : vector<48x32xf32>
    %134 = vector.broadcast %115 : vector<1x32xf32> to vector<48x32xf32>
    %135 = arith.addf %133, %134 : vector<48x32xf32>
    %c0_56 = arith.constant 0 : index
    %c0_57 = arith.constant 0 : index
    %c0_58 = arith.constant 0 : index
    %136 = vector.load %arg15[%c0_56, %c0_57, %c0_58] : memref<1x32x64xf32, #tpu.memory_space<vmem>>, vector<1x32x64xf32>
    %137 = vector.shape_cast %136 : vector<1x32x64xf32> to vector<32x64xf32>
    %cst_59 = arith.constant dense<0.000000e+00> : vector<48x64xf32>
    %138 = tpu.matmul %135, %137, %cst_59 {dimension_numbers = #tpu.dot_dimension_numbers<[1], [0], [0], [1], [0, 0, 1, 1], [], []>} : vector<48x32xf32>, vector<32x64xf32>, vector<48x64xf32> -> vector<48x64xf32>
    %c0_60 = arith.constant 0 : index
    %c0_61 = arith.constant 0 : index
    %c0_62 = arith.constant 0 : index
    %139 = vector.load %arg16[%c0_60, %c0_61, %c0_62] : memref<1x1x64xf32, #tpu.memory_space<vmem>>, vector<1x1x64xf32>
    %140 = vector.shape_cast %139 : vector<1x1x64xf32> to vector<1x64xf32>
    %141 = vector.broadcast %140 : vector<1x64xf32> to vector<48x64xf32>
    %142 = arith.addf %138, %141 : vector<48x64xf32>
    %cst_63 = arith.constant 0.707106769 : f32
    %143 = vector.broadcast %cst_63 : f32 to vector<48x64xf32>
    %144 = arith.mulf %142, %143 : vector<48x64xf32>
    %cst_64 = arith.constant -4.000000e+00 : f32
    %cst_65 = arith.constant 4.000000e+00 : f32
    %145 = vector.broadcast %cst_64 : f32 to vector<48x64xf32>
    %146 = arith.maximumf %145, %144 : vector<48x64xf32>
    %147 = vector.broadcast %cst_65 : f32 to vector<48x64xf32>
    %148 = arith.minimumf %147, %146 : vector<48x64xf32>
    %149 = arith.mulf %148, %148 : vector<48x64xf32>
    %cst_66 = arith.constant -1.36307118E-10 : f32
    %150 = vector.broadcast %cst_66 : f32 to vector<48x64xf32>
    %151 = arith.mulf %149, %150 : vector<48x64xf32>
    %cst_67 = arith.constant 1.38534073E-8 : f32
    %152 = vector.broadcast %cst_67 : f32 to vector<48x64xf32>
    %153 = arith.addf %151, %152 : vector<48x64xf32>
    %154 = arith.mulf %149, %153 : vector<48x64xf32>
    %cst_68 = arith.constant -1.05051197E-6 : f32
    %155 = vector.broadcast %cst_68 : f32 to vector<48x64xf32>
    %156 = arith.addf %154, %155 : vector<48x64xf32>
    %157 = arith.mulf %149, %156 : vector<48x64xf32>
    %cst_69 = arith.constant -2.84625312E-5 : f32
    %158 = vector.broadcast %cst_69 : f32 to vector<48x64xf32>
    %159 = arith.addf %157, %158 : vector<48x64xf32>
    %160 = arith.mulf %149, %159 : vector<48x64xf32>
    %cst_70 = arith.constant -3.67495319E-4 : f32
    %161 = vector.broadcast %cst_70 : f32 to vector<48x64xf32>
    %162 = arith.addf %160, %161 : vector<48x64xf32>
    %163 = arith.mulf %149, %162 : vector<48x64xf32>
    %cst_71 = arith.constant -1.477300e-03 : f32
    %164 = vector.broadcast %cst_71 : f32 to vector<48x64xf32>
    %165 = arith.addf %163, %164 : vector<48x64xf32>
    %166 = arith.mulf %149, %165 : vector<48x64xf32>
    %cst_72 = arith.constant -0.00804801657 : f32
    %167 = vector.broadcast %cst_72 : f32 to vector<48x64xf32>
    %168 = arith.addf %166, %167 : vector<48x64xf32>
    %169 = arith.mulf %148, %168 : vector<48x64xf32>
    %cst_73 = arith.constant -1.45660715E-5 : f32
    %170 = vector.broadcast %cst_73 : f32 to vector<48x64xf32>
    %171 = arith.mulf %149, %170 : vector<48x64xf32>
    %cst_74 = arith.constant -2.13374049E-4 : f32
    %172 = vector.broadcast %cst_74 : f32 to vector<48x64xf32>
    %173 = arith.addf %171, %172 : vector<48x64xf32>
    %174 = arith.mulf %149, %173 : vector<48x64xf32>
    %cst_75 = arith.constant -0.00168282702 : f32
    %175 = vector.broadcast %cst_75 : f32 to vector<48x64xf32>
    %176 = arith.addf %174, %175 : vector<48x64xf32>
    %177 = arith.mulf %149, %176 : vector<48x64xf32>
    %cst_76 = arith.constant -0.00737332925 : f32
    %178 = vector.broadcast %cst_76 : f32 to vector<48x64xf32>
    %179 = arith.addf %177, %178 : vector<48x64xf32>
    %180 = arith.mulf %149, %179 : vector<48x64xf32>
    %cst_77 = arith.constant -0.0142647391 : f32
    %181 = vector.broadcast %cst_77 : f32 to vector<48x64xf32>
    %182 = arith.addf %180, %181 : vector<48x64xf32>
    %183 = tpu.reciprocal %182 : vector<48x64xf32> -> vector<48x64xf32>
    %184 = arith.mulf %169, %183 : vector<48x64xf32>
    %cst_78 = arith.constant 5.000000e-01 : f32
    %185 = vector.broadcast %cst_78 : f32 to vector<48x64xf32>
    %186 = arith.addf %185, %184 : vector<48x64xf32>
    %187 = arith.mulf %142, %186 : vector<48x64xf32>
    %c0_79 = arith.constant 0 : index
    %c0_80 = arith.constant 0 : index
    %c0_81 = arith.constant 0 : index
    %188 = vector.load %arg17[%c0_79, %c0_80, %c0_81] : memref<1x64x32xf32, #tpu.memory_space<vmem>>, vector<1x64x32xf32>
    %189 = vector.shape_cast %188 : vector<1x64x32xf32> to vector<64x32xf32>
    %cst_82 = arith.constant dense<0.000000e+00> : vector<48x32xf32>
    %190 = tpu.matmul %187, %189, %cst_82 {dimension_numbers = #tpu.dot_dimension_numbers<[1], [0], [0], [1], [0, 0, 1, 1], [], []>} : vector<48x64xf32>, vector<64x32xf32>, vector<48x32xf32> -> vector<48x32xf32>
    %c0_83 = arith.constant 0 : index
    %c0_84 = arith.constant 0 : index
    %c0_85 = arith.constant 0 : index
    %191 = vector.load %arg18[%c0_83, %c0_84, %c0_85] : memref<1x1x32xf32, #tpu.memory_space<vmem>>, vector<1x1x32xf32>
    %192 = vector.shape_cast %191 : vector<1x1x32xf32> to vector<1x32xf32>
    %193 = vector.broadcast %192 : vector<1x32xf32> to vector<48x32xf32>
    %194 = arith.addf %190, %193 : vector<48x32xf32>
    %c0_86 = arith.constant 0 : index
    %c0_87 = arith.constant 0 : index
    %195 = vector.load %arg24[%c0_86, %c0_87] : memref<48x32xf32, #tpu.memory_space<vmem>>, vector<48x32xf32>
    tpu.vector_store %arg24[%c0_86, %c0_87], %194 {strides = array<i32>} : memref<48x32xf32, #tpu.memory_space<vmem>>, vector<48x32xf32>,
    %c1_i32 = arith.constant 1 : i32
    %196 = arith.cmpi eq, %arg0, %c1_i32 : i32
    %197 = arith.extui %196 : i1 to i32
    %c0_i32_88 = arith.constant 0 : i32
    %198 = arith.cmpi ne, %197, %c0_i32_88 : i32
    scf.if %198 {
      %c0_89 = arith.constant 0 : index
      %c0_90 = arith.constant 0 : index
      %199 = vector.load %arg7[%c0_89, %c0_90] : memref<2x48xf32, #tpu.memory_space<vmem>>, vector<2x48xf32>
      %cst_91 = arith.constant dense<0.000000e+00> : vector<2x32xf32>
      %200 = tpu.matmul %199, %194, %cst_91 {dimension_numbers = #tpu.dot_dimension_numbers<[1], [0], [0], [1], [0, 0, 1, 1], [], []>} : vector<2x48xf32>, vector<48x32xf32>, vector<2x32xf32> -> vector<2x32xf32>
      %c0_92 = arith.constant 0 : index
      %c0_93 = arith.constant 0 : index
      %201 = vector.load %arg19[%c0_92, %c0_93] : memref<1x32xf32, #tpu.memory_space<vmem>>, vector<1x32xf32>
      %c0_94 = arith.constant 0 : index
      %c0_95 = arith.constant 0 : index
      %202 = vector.load %arg20[%c0_94, %c0_95] : memref<1x32xf32, #tpu.memory_space<vmem>>, vector<1x32xf32>
      %cst_96 = arith.constant dense<0.000000e+00> : vector<2xf32>
      %203 = vector.multi_reduction <add>, %200, %cst_96 [1] : vector<2x32xf32> to vector<2xf32>
      %204 = vector.shape_cast %203 : vector<2xf32> to vector<2x1xf32>
      %cst_97 = arith.constant 3.200000e+01 : f32
      %205 = vector.broadcast %cst_97 : f32 to vector<2x1xf32>
      %206 = arith.divf %204, %205 : vector<2x1xf32>
      %207 = vector.broadcast %206 : vector<2x1xf32> to vector<2x32xf32>
      %208 = arith.subf %200, %207 : vector<2x32xf32>
      %209 = arith.mulf %208, %208 : vector<2x32xf32>
      %cst_98 = arith.constant dense<0.000000e+00> : vector<2xf32>
      %210 = vector.multi_reduction <add>, %209, %cst_98 [1] : vector<2x32xf32> to vector<2xf32>
      %211 = vector.shape_cast %210 : vector<2xf32> to vector<2x1xf32>
      %cst_99 = arith.constant 3.200000e+01 : f32
      %212 = vector.broadcast %cst_99 : f32 to vector<2x1xf32>
      %213 = arith.divf %211, %212 : vector<2x1xf32>
      %cst_100 = arith.constant 9.99999974E-6 : f32
      %214 = vector.broadcast %cst_100 : f32 to vector<2x1xf32>
      %215 = arith.addf %213, %214 : vector<2x1xf32>
      %216 = math.rsqrt %215 : vector<2x1xf32>
      %217 = vector.broadcast %216 : vector<2x1xf32> to vector<2x32xf32>
      %218 = arith.mulf %208, %217 : vector<2x32xf32>
      %219 = vector.broadcast %201 : vector<1x32xf32> to vector<2x32xf32>
      %220 = arith.mulf %218, %219 : vector<2x32xf32>
      %221 = vector.broadcast %202 : vector<1x32xf32> to vector<2x32xf32>
      %222 = arith.addf %220, %221 : vector<2x32xf32>
      %c0_101 = arith.constant 0 : index
      %c0_102 = arith.constant 0 : index
      %223 = vector.load %arg21[%c0_101, %c0_102] : memref<32x10xf32, #tpu.memory_space<vmem>>, vector<32x10xf32>
      %cst_103 = arith.constant dense<0.000000e+00> : vector<2x10xf32>
      %224 = tpu.matmul %222, %223, %cst_103 {dimension_numbers = #tpu.dot_dimension_numbers<[1], [0], [0], [1], [0, 0, 1, 1], [], []>} : vector<2x32xf32>, vector<32x10xf32>, vector<2x10xf32> -> vector<2x10xf32>
      %c0_104 = arith.constant 0 : index
      %c0_105 = arith.constant 0 : index
      %225 = vector.load %arg22[%c0_104, %c0_105] : memref<1x10xf32, #tpu.memory_space<vmem>>, vector<1x10xf32>
      %226 = vector.broadcast %225 : vector<1x10xf32> to vector<2x10xf32>
      %227 = arith.addf %224, %226 : vector<2x10xf32>
      %c0_106 = arith.constant 0 : index
      %c0_107 = arith.constant 0 : index
      %228 = vector.load %arg23[%c0_106, %c0_107] : memref<2x10xf32, #tpu.memory_space<vmem>>, vector<2x10xf32>
      tpu.vector_store %arg23[%c0_106, %c0_107], %227 {strides = array<i32>} : memref<2x10xf32, #tpu.memory_space<vmem>>, vector<2x10xf32>,
    } else {
    }
    return
  }
  func.func @transform_0(%arg0: i32) -> (i32, i32) {
    %c0_i32 = arith.constant 0 : i32
    %c0_i32_0 = arith.constant 0 : i32
    %c0_i32_1 = arith.constant 0 : i32
    return %c0_i32, %c0_i32_0 : i32, i32
  }
  func.func @transform_1(%arg0: i32) -> (i32, i32) {
    %c0_i32 = arith.constant 0 : i32
    %c0_i32_0 = arith.constant 0 : i32
    %c0_i32_1 = arith.constant 0 : i32
    return %c0_i32, %c0_i32_0 : i32, i32
  }
  func.func @transform_2(%arg0: i32) -> (i32, i32) {
    %c0_i32 = arith.constant 0 : i32
    %c0_i32_0 = arith.constant 0 : i32
    %c0_i32_1 = arith.constant 0 : i32
    return %c0_i32, %c0_i32_0 : i32, i32
  }
  func.func @transform_3(%arg0: i32) -> (i32, i32) {
    %c0_i32 = arith.constant 0 : i32
    %c0_i32_0 = arith.constant 0 : i32
    %c0_i32_1 = arith.constant 0 : i32
    return %c0_i32, %c0_i32_0 : i32, i32
  }
  func.func @transform_4(%arg0: i32) -> (i32, i32) {
    %c0_i32 = arith.constant 0 : i32
    %c0_i32_0 = arith.constant 0 : i32
    %c0_i32_1 = arith.constant 0 : i32
    return %c0_i32, %c0_i32_0 : i32, i32
  }
  func.func @transform_5(%arg0: i32) -> (i32, i32) {
    %c0_i32 = arith.constant 0 : i32
    %c0_i32_0 = arith.constant 0 : i32
    %c0_i32_1 = arith.constant 0 : i32
    return %c0_i32, %c0_i32_0 : i32, i32
  }
  func.func @transform_6(%arg0: i32) -> (i32, i32) {
    %c0_i32 = arith.constant 0 : i32
    %c0_i32_0 = arith.constant 0 : i32
    %c0_i32_1 = arith.constant 0 : i32
    return %c0_i32, %c0_i32_0 : i32, i32
  }
  func.func @transform_7(%arg0: i32) -> (i32, i32, i32) {
    %c0_i32 = arith.constant 0 : i32
    %c0_i32_0 = arith.constant 0 : i32
    %c0_i32_1 = arith.constant 0 : i32
    return %arg0, %c0_i32, %c0_i32_0 : i32, i32, i32
  }
  func.func @transform_8(%arg0: i32) -> (i32, i32, i32) {
    %c0_i32 = arith.constant 0 : i32
    %c0_i32_0 = arith.constant 0 : i32
    %c0_i32_1 = arith.constant 0 : i32
    return %arg0, %c0_i32, %c0_i32_0 : i32, i32, i32
  }
  func.func @transform_9(%arg0: i32) -> (i32, i32, i32) {
    %c0_i32 = arith.constant 0 : i32
    %c0_i32_0 = arith.constant 0 : i32
    %c0_i32_1 = arith.constant 0 : i32
    return %arg0, %c0_i32, %c0_i32_0 : i32, i32, i32
  }
  func.func @transform_10(%arg0: i32) -> (i32, i32, i32) {
    %c0_i32 = arith.constant 0 : i32
    %c0_i32_0 = arith.constant 0 : i32
    %c0_i32_1 = arith.constant 0 : i32
    return %arg0, %c0_i32, %c0_i32_0 : i32, i32, i32
  }
  func.func @transform_11(%arg0: i32) -> (i32, i32, i32) {
    %c0_i32 = arith.constant 0 : i32
    %c0_i32_0 = arith.constant 0 : i32
    %c0_i32_1 = arith.constant 0 : i32
    return %arg0, %c0_i32, %c0_i32_0 : i32, i32, i32
  }
  func.func @transform_12(%arg0: i32) -> (i32, i32, i32) {
    %c0_i32 = arith.constant 0 : i32
    %c0_i32_0 = arith.constant 0 : i32
    %c0_i32_1 = arith.constant 0 : i32
    return %arg0, %c0_i32, %c0_i32_0 : i32, i32, i32
  }
  func.func @transform_13(%arg0: i32) -> (i32, i32, i32) {
    %c0_i32 = arith.constant 0 : i32
    %c0_i32_0 = arith.constant 0 : i32
    %c0_i32_1 = arith.constant 0 : i32
    return %arg0, %c0_i32, %c0_i32_0 : i32, i32, i32
  }
  func.func @transform_14(%arg0: i32) -> (i32, i32, i32) {
    %c0_i32 = arith.constant 0 : i32
    %c0_i32_0 = arith.constant 0 : i32
    %c0_i32_1 = arith.constant 0 : i32
    return %arg0, %c0_i32, %c0_i32_0 : i32, i32, i32
  }
  func.func @transform_15(%arg0: i32) -> (i32, i32, i32) {
    %c0_i32 = arith.constant 0 : i32
    %c0_i32_0 = arith.constant 0 : i32
    %c0_i32_1 = arith.constant 0 : i32
    return %arg0, %c0_i32, %c0_i32_0 : i32, i32, i32
  }
  func.func @transform_16(%arg0: i32) -> (i32, i32, i32) {
    %c0_i32 = arith.constant 0 : i32
    %c0_i32_0 = arith.constant 0 : i32
    %c0_i32_1 = arith.constant 0 : i32
    return %arg0, %c0_i32, %c0_i32_0 : i32, i32, i32
  }
  func.func @transform_17(%arg0: i32) -> (i32, i32, i32) {
    %c0_i32 = arith.constant 0 : i32
    %c0_i32_0 = arith.constant 0 : i32
    %c0_i32_1 = arith.constant 0 : i32
    return %arg0, %c0_i32, %c0_i32_0 : i32, i32, i32
  }
  func.func @transform_18(%arg0: i32) -> (i32, i32) {
    %c0_i32 = arith.constant 0 : i32
    %c0_i32_0 = arith.constant 0 : i32
    %c0_i32_1 = arith.constant 0 : i32
    return %c0_i32, %c0_i32_0 : i32, i32
  }
  func.func @transform_19(%arg0: i32) -> (i32, i32) {
    %c0_i32 = arith.constant 0 : i32
    %c0_i32_0 = arith.constant 0 : i32
    %c0_i32_1 = arith.constant 0 : i32
    return %c0_i32, %c0_i32_0 : i32, i32
  }
  func.func @transform_20(%arg0: i32) -> (i32, i32) {
    %c0_i32 = arith.constant 0 : i32
    %c0_i32_0 = arith.constant 0 : i32
    %c0_i32_1 = arith.constant 0 : i32
    return %c0_i32, %c0_i32_0 : i32, i32
  }
  func.func @transform_21(%arg0: i32) -> (i32, i32) {
    %c0_i32 = arith.constant 0 : i32
    %c0_i32_0 = arith.constant 0 : i32
    %c0_i32_1 = arith.constant 0 : i32
    return %c0_i32, %c0_i32_0 : i32, i32
  }
  func.func @transform_22(%arg0: i32) -> (i32, i32) {
    %c0_i32 = arith.constant 0 : i32
    %c0_i32_0 = arith.constant 0 : i32
    %c0_i32_1 = arith.constant 0 : i32
    return %c0_i32, %c0_i32_0 : i32, i32
  }
}

</mosaic_0001>

<bundles_post_ra>
// kernel: kwt_forward.1
= control target key start
LH: loop header
LB: loop body
LE: loop exit
PB: predicated region body
PF: predicated region fallthrough
CT: control target
= control target key end

     0   :  { %s5759_s0 = inlined_call_operand.vmem [shape: f32[32,16], index: 0, kind: input, shape index: {}]   ;;  %s5760_s1 = inlined_call_operand.vmem [shape: f32[16,32], index: 1, kind: input, shape index: {}]   ;;  %s5761_s2 = inlined_call_operand.vmem [shape: f32[1,32], index: 2, kind: input, shape index: {}]   ;;  %s5762_s3 = inlined_call_operand.vmem [shape: f32[1,32], index: 3, kind: input, shape index: {}]   ;;  %s5763_s4 = inlined_call_operand.vmem [shape: f32[17,32], index: 4, kind: input, shape index: {}]   ;;  %s5764_s5 = inlined_call_operand.vmem [shape: f32[48,48], index: 5, kind: input, shape index: {}]   ;;  %s5765_s6 = inlined_call_operand.vmem [shape: f32[2,48], index: 6, kind: input, shape index: {}]   ;;  %s5766_s7 = inlined_call_operand.vmem [shape: f32[2,1,32], index: 7, kind: input, shape index: {}]   ;;  %s5767_s8 = inlined_call_operand.vmem [shape: f32[2,1,32], index: 8, kind: input, shape index: {}]   ;;  %s5768_s9 = inlined_call_operand.vmem [shape: f32[2,32,96], index: 9, kind: input, shape index: {}]   ;;  %s5769_s10 = inlined_call_operand.vmem [shape: f32[2,32,32], index: 10, kind: input, shape index: {}]   ;;  %s5770_s11 = inlined_call_operand.vmem [shape: f32[2,1,32], index: 11, kind: input, shape index: {}]   ;;  %s5771_s12 = inlined_call_operand.vmem [shape: f32[2,1,32], index: 12, kind: input, shape index: {}]   ;;  %s5772_s13 = inlined_call_operand.vmem [shape: f32[2,1,32], index: 13, kind: input, shape index: {}]   ;;  %s5773_s14 = inlined_call_operand.vmem [shape: f32[2,32,64], index: 14, kind: input, shape index: {}]   ;;  %s5774_s15 = inlined_call_operand.vmem [shape: f32[2,1,64], index: 15, kind: input, shape index: {}]   ;;  %s5775_s16 = inlined_call_operand.vmem [shape: f32[2,64,32], index: 16, kind: input, shape index: {}]   ;;  %s5776_s17 = inlined_call_operand.vmem [shape: f32[2,1,32], index: 17, kind: input, shape index: {}]   ;;  %s5777_s18 = inlined_call_operand.vmem [shape: f32[1,32], index: 18, kind: input, shape index: {}]   ;;  %s5778_s19 = inlined_call_operand.vmem [shape: f32[1,32], index: 19, kind: input, shape index: {}]   ;;  %s5779_s20 = inlined_call_operand.vmem [shape: f32[32,10], index: 20, kind: input, shape index: {}]   ;;  %s5780_s21 = inlined_call_operand.vmem [shape: f32[1,10], index: 21, kind: input, shape index: {}]   ;;  %s5781_s22 = inlined_call_operand.hbm [shape: f32[2,10], index: 22, kind: output, shape index: {}]  }
   0x1   :  { %5788 = sst [smem:[#allocation7_spill]] %s5759_s0 }
   0x2   :  { %5789 = sst [smem:[#allocation8_spill]] %s5760_s1 }
   0x3   :  { %5790 = sst [smem:[#allocation9_spill]] %s5761_s2 }
   0x4   :  { %5791 = sst [smem:[#allocation10_spill]] %s5762_s3 }
   0x5   :  { %5792 = sst [smem:[#allocation11_spill]] %s5763_s4 }
   0x6   :  { %5793 = sst [smem:[#allocation12_spill]] %s5764_s5 }
   0x7   :  { %5794 = sst [smem:[#allocation13_spill]] %s5765_s6 }
   0x8   :  { %5795 = sst [smem:[#allocation14_spill]] %s5768_s9 }
   0x9   :  { %5796 = sst [smem:[#allocation15_spill]] %s5769_s10 }
   0xa   :  { %5797 = sst [smem:[#allocation16_spill]] %s5777_s18 }
   0xb   :  { %5798 = sst [smem:[#allocation17_spill]] %s5778_s19 }
   0xc   :  { %5799 = sst [smem:[#allocation18_spill]] %s5780_s21 }
   0xd   :  { %5800 = sst [smem:[#allocation19_spill]] %s5781_s22 }
   0xe   :  { %27 = vsyncpa [#allocation4], 0  ;;  %s4945_s3 = smov 0  }
   0xf LB: > { %5801 = sst [smem:[#allocation6_spill]] %s4810_s3  ;;  %s4951_s28 = sadd.s32 4294967295, %s4810_s3   ;;  %s4810_s3 = sphi %s4945_s3, %s33_s3  }
  0x10   : > { %p3725_p0 = scmp.ge.s32.totalorder %s4810_s3, 1  ;;  %p694_p1 = scmp.lt.s32.totalorder %s4810_s3, 3 }
  0x12   : > { %p695_p2 = pnand %p3725_p0, %p694_p1 }
  0x13   : > { %p787_p3 = scmp.lt.s32.totalorder (!%p695_p2), %s4951_s28, 1  ;;  %s5802_s9 = sld [smem:[#allocation14_spill]] (!%p695_p2) }
  0x14   : > { %698 = sbr.rel (%p695_p2) target bundleno = 5321 (0x14c9), region = 108  ;;  %s5803_s10 = sld [smem:[#allocation15_spill]] (!%p695_p2) }
  0x15   : > { %p3734_p4 = scmp.ne.s32.totalorder (!%p695_p2), %s4951_s28, 0 }
  0x1b   : > { %s4957_s29 = scalar_select %p787_p3, %s4951_s28, 1 }
  0x1c   : > { %831 = sbr.rel (%p3734_p4) target bundleno = 263 (0x107), region = 112  ;;  %s5804_s1 = sld [smem:[#allocation8_spill]] (!%p3734_p4)  ;;  %vm845_vm0 = vcmask (!%p3734_p4), 130048   ;;  %vm951_vm1 = vcmask (!%p3734_p4), 1046528   ;;  %vm965_vm2 = vcmask (!%p3734_p4), 1040384   ;;  %vm984_vm3 = vcmask (!%p3734_p4), 261120  }
  0x1d   : > { %s3859_s24 = sshll.u32 %s4957_s29, 5  ;;  %s811_s19 = scalar_lea.vmem %s5772_s13, %s4957_s29 }
  0x1e   : > { %s4975_s30 = scalar_lea.vmem %s5802_s9, %s3859_s24  ;;  %s4980_s22 = scalar_lea.vmem %s5803_s10, %s3859_s24 }
  0x1f   : > { %s4993_s26 = scalar_lea.vmem %s5773_s14, %s3859_s24  ;;  %s819_s9 = scalar_lea.vmem %s5774_s15, %s4957_s29 }
  0x20   : > { %s3862_s3 = sshll.u32 %s4957_s29, 6  ;;  %s5805_s10 = sld [smem:[#allocation7_spill]] (!%p3734_p4) }
  0x21   : > { %s5007_s23 = scalar_lea.vmem %s5775_s16, %s3862_s3  ;;  %s5806_s2 = sld [smem:[#allocation11_spill]] (!%p3734_p4) }
  0x22   : > { %v836_v0 = vld [vmem:[%s5804_s1] sm:$0xff] (!%p3734_p4)  ;;  %v837_v1 = vld [vmem:[%s5804_s1 + $0x8] sm:$0xff] (!%p3734_p4)  ;;  %s5807_s5 = sld [smem:[#allocation9_spill]] (!%p3734_p4)  ;;  %s5808_s25 = sld [smem:[#allocation10_spill]] (!%p3734_p4) }
  0x23   : > { %v4301_v3 = vpack.c.bf16 %v837_v1, %v836_v0 }
  0x25   : > { %4302 = vmatprep.subr.bf16.mxu0 %v4301_v3  ;;  %4480 = vmatprep.subr.bf16.mxu1 %v4301_v3 }
  0x26   : > { %v832_v2 = vld [vmem:[%s5805_s10] sm:$0xff]  ;;  %v834_v4 = vld [vmem:[%s5805_s10 + $0x10] sm:$0xff]  ;;  %4304 = vmatpush3.bf16.msra.mxu0 %v4301_v3  ;;  %4481 = vmatpush3.bf16.msra.mxu1 %v4301_v3  ;;  %v833_v5 = vld [vmem:[%s5805_s10 + $0x8] sm:$0xff] }
  0x27   : > { %4025 = vmatprep.mubr.msk.f32.mxu0 %vm845_vm0, %v832_v2  ;;  %4028 = vmatprep.mubr.msk.f32.mxu1 %vm845_vm0, %v834_v4  ;;  %v835_v6 = vld [vmem:[%s5805_s10 + $0x18] sm:$0xff]  ;;  %v944_v7 = vld [vmem:[%s5806_s2 + $0x8] sm:$0xff]  ;;  %v945_v8 = vld [vmem:[%s5806_s2 + $0x10] sm:$0x1] }
  0x28   : > { %v943_v9 = vld [vmem:[%s5806_s2] sm:$0xff]  ;;  %v953_v10 = vrot.slane %v944_v7, 1  ;;  %v955_v11 = vrot.slane %v945_v8, 1 }
  0x29   : > { %4026 = vmatmul.mubr.msk.f32.vlgmr.msra.gmra.mrb[0].mxu0 %vm845_vm0, %v833_v5  ;;  %4029 = vmatmul.mubr.msk.f32.vlgmr.msra.gmra.mrb[0].mxu1 %vm845_vm0, %v835_v6  ;;  %v952_v12 = vrot.slane %v943_v9, 1  ;;  %v3735_v13 = vld [vmem:[%s5807_s5] ss:$0 sm:$0xff] }
  0x2a   : > { %v956_v15 = vsel %vm951_vm1, %v953_v10, %v955_v11  ;;  %v946_v20 = vld [vmem:[%s5808_s25] sm:$0x1] }
  0x2b   : > { %v954_v21 = vsel %vm951_vm1, %v952_v12, %v953_v10  ;;  %v947_v27 = vadd.f32 %v946_v20, %v943_v9 }
  0xfc   : > { %v4027_v14 = vpop.f32.mrb[0].mxu0  ;;  %v4030_v16 = vpop.f32.mrb[0].mxu1 }
  0xfd   : > { %v930_v17 = vadd.f32 %v4027_v14, %v3735_v13  ;;  %v940_v18 = vadd.f32 %v4030_v16, %v3735_v13  ;;  %v924_v19 = vpop.f32.mrb[1].mxu0  ;;  %v934_v22 = vpop.f32.mrb[1].mxu1 }
  0xfe   : > { %v925_v23 = vadd.f32 %v3735_v13, %v924_v19  ;;  %v935_v24 = vadd.f32 %v3735_v13, %v934_v22 }
  0xff   : > { %v960_v25 = vadd.f32 %v956_v15, %v930_v17  ;;  %v962_v26 = vadd.f32 %v956_v15, %v940_v18 }
 0x100   : > { %v959_v28 = vadd.f32 %v954_v21, %v925_v23  ;;  %v961_v29 = vadd.f32 %v954_v21, %v935_v24 }
 0x101   : > { %v967_v30 = vrot.slane %v960_v25, 7  ;;  %v975_v31 = vrot.slane %v962_v26, 7 }
 0x102   : > { %v966_v32 = vrot.slane %v959_v28, 7  ;;  %v974_v33 = vrot.slane %v961_v29, 7 }
 0x103   : > { %v981_v34 = vsel %vm965_vm2, %v967_v30, 0.0  ;;  %v983_v35 = vsel %vm965_vm2, %v975_v31, 0.0 }
 0x104   : > { %987 = vst.msk [vmem:[#allocation2 + $0x10] sm:$0xff] %vm984_vm3, %v981_v34  ;;  %990 = vst.msk [vmem:[#allocation2 + $0x28] sm:$0xff] %vm984_vm3, %v983_v35  ;;  %v968_v36 = vsel %vm965_vm2, %v966_v32, %v967_v30  ;;  %v980_v37 = vsel %vm965_vm2, %v947_v27, %v966_v32  ;;  %v976_v38 = vsel %vm965_vm2, %v974_v33, %v975_v31 }
 0x105   : > { %v982_v39 = vsel %vm965_vm2, %v947_v27, %v974_v33  ;;  %985 = vst.msk [vmem:[#allocation2] sm:$0xff] %vm984_vm3, %v980_v37  ;;  %986 = vst.msk [vmem:[#allocation2 + $0x8] sm:$0xff] %vm984_vm3, %v968_v36 }
 0x106   : > { %988 = vst.msk [vmem:[#allocation2 + $0x18] sm:$0xff] %vm984_vm3, %v982_v39  ;;  %989 = vst.msk [vmem:[#allocation2 + $0x20] sm:$0xff] %vm984_vm3, %v976_v38 }
 0x107 PF: > { %vm999_vm4 = vcmask 261120   ;;  %v1103_v18 = vld [vmem:[%s4975_s30] sm:$0xff]  ;;  %v1104_v19 = vld [vmem:[%s4975_s30 + $0x8] sm:$0xff]  ;;  %v1105_v21 = vld [vmem:[%s4975_s30 + $0x10] sm:$0xff]  ;;  %s5809_s27 = scalar_lea.vmem %s5766_s7, %s4957_s29  ;;  %s5810_s21 = scalar_lea.vmem %s5767_s8, %s4957_s29  ;;  %vm1244_vm5 = vcmask 64512   ;;  %vm1376_vm7 = vcmask 392192  }
 0x108   : > { %v4305_v20 = vpack.c.bf16 %v1104_v19, %v1103_v18  ;;  %v1106_v22 = vld [vmem:[%s4975_s30 + $0x18] sm:$0xff]  ;;  %s4812_s0 = smov 96   ;;  %vm5142_vm6 = vmpackc.low %vm1244_vm5, %vm1244_vm5  ;;  %s5813_s6 = sld [smem:[#allocation12_spill]]  ;;  %vm2708_vm8 = vcmask 130048   ;;  %vm2715_vm9 = vcmask 195584   ;;  %vm3263_vm10 = vcmask 523264  }
 0x109   : > { %v4309_v23 = vpack.c.bf16 %v1106_v22, %v1105_v21  ;;  %s4813_s25 = smov 64   ;;  %s4814_s18 = smov 88  }
 0x10a   : > { %4306 = vmatprep.subr.bf16.mxu0 %v4305_v20  ;;  %s4815_s30 = smov 120   ;;  %s4817_s3 = smov 80  }
 0x10b   : > { %v993_v41 = vld [vmem:[#allocation2 + $0x10] sm:$0xff]  ;;  %v996_v49 = vld [vmem:[#allocation2 + $0x28] sm:$0xff]  ;;  %4308 = vmatpush3.bf16.msra.mxu0 %v4305_v20  ;;  %s4818_s4 = smov 112   ;;  %s4821_s5 = smov 104  }
 0x10c   : > { %v991_v40 = vld [vmem:[#allocation2] sm:$0xff]  ;;  %v992_v42 = vld [vmem:[#allocation2 + $0x8] sm:$0xff]  ;;  %v1006_v44 = vsel %vm999_vm4, %v993_v41, 0.0  ;;  %v1015_v51 = vsel %vm999_vm4, %v996_v49, 0.0  ;;  %4310 = vmatprep.subr.bf16.mxu0 %v4309_v23  ;;  %p3849_p5 = scmp.ne.s32.totalorder %s4951_s28, 1 }
 0x10d   : > { %v1000_v43 = vsel %vm999_vm4, %v991_v40, 0.0  ;;  %v994_v45 = vld [vmem:[#allocation2 + $0x18] sm:$0xff]  ;;  %1007 = vadd.xlane.f32.xlu1 %v1006_v44  ;;  %v1003_v46 = vsel %vm999_vm4, %v992_v42, 0.0  ;;  %v995_v48 = vld [vmem:[#allocation2 + $0x20] sm:$0xff]  ;;  %vm4827_vm11 = vmmov (!%p3849_p5), 0   ;;  %vm3463_vm12 = vcmask (!%p3849_p5), 254976  }
 0x10e   : > { %1001 = vadd.xlane.f32.xlu0 %v1000_v43  ;;  %v1009_v47 = vsel %vm999_vm4, %v994_v45, 0.0  ;;  %v1012_v50 = vsel %vm999_vm4, %v995_v48, 0.0  ;;  %v3740_v43 = vld [vmem:[%s5809_s27] ss:$0 sm:$0xff]  ;;  %s4816_s27 = smov 56   ;;  %vm3575_vm13 = vcmask (!%p3849_p5), 74752  }
 0x10f   : > { %4312 = vmatpush3.bf16.msra.mxu0 %v4309_v23 }
 0x111   : > { %1010 = vadd.xlane.f32.xlu1 %v1009_v47 }
 0x112   : > { %1004 = vadd.xlane.f32.xlu0 %v1003_v46 }
 0x115   : > { %1016 = vadd.xlane.f32.xlu1 %v1015_v51 }
 0x116   : > { %1013 = vadd.xlane.f32.xlu0 %v1012_v50 }
 0x19a   : > { %v1008_v53 = vpop.xlane.xlu1 %1007 }
 0x19b   : > { %v1002_v52 = vpop.xlane.xlu0 %1001  ;;  %v1021_v55 = vmul.f32 0.03125, %v1008_v53 }
 0x19c   : > { %v1019_v54 = vmul.f32 0.03125, %v1002_v52 }
 0x19d   : > { %v5057_v57 = vsub.f32 %v993_v41, %v1021_v55 }
 0x19e   : > { %v5055_v56 = vsub.f32 %v991_v40, %v1019_v54  ;;  %v1011_v59 = vpop.xlane.xlu1 %1010 }
 0x19f   : > { %v1005_v58 = vpop.xlane.xlu0 %1004  ;;  %v1022_v61 = vmul.f32 0.03125, %v1011_v59  ;;  %v1033_v63 = vmul.f32 %v5057_v57, %v5057_v57 }
 0x1a0   : > { %v1020_v60 = vmul.f32 0.03125, %v1005_v58  ;;  %v1031_v62 = vmul.f32 %v5055_v56, %v5055_v56 }
 0x1a1   : > { %v5065_v1 = vsub.f32 %v994_v45, %v1022_v61  ;;  %v1043_v5 = vsel %vm999_vm4, %v1033_v63, 0.0  ;;  %v3741_v45 = vld [vmem:[%s5810_s21] ss:$0 sm:$0xff]  ;;  %s4819_s21 = smov 48  }
 0x1a2   : > { %v5063_v0 = vsub.f32 %v992_v42, %v1020_v60  ;;  %v1037_v2 = vsel %vm999_vm4, %v1031_v62, 0.0  ;;  %v1017_v4 = vpop.xlane.xlu1 %1016 }
 0x1a3   : > { %1038 = vadd.xlane.f32.xlu0 %v1037_v2  ;;  %v1014_v3 = vpop.xlane.xlu0 %1013  ;;  %v1024_v7 = vmul.f32 0.03125, %v1017_v4  ;;  %v1034_v9 = vmul.f32 %v5065_v1, %v5065_v1 }
 0x1a4   : > { %v1023_v6 = vmul.f32 0.03125, %v1014_v3  ;;  %v1032_v8 = vmul.f32 %v5063_v0, %v5063_v0 }
 0x1a5   : > { %v5075_v11 = vsub.f32 %v996_v49, %v1024_v7  ;;  %v1046_v13 = vsel %vm999_vm4, %v1034_v9, 0.0 }
 0x1a6   : > { %v5073_v10 = vsub.f32 %v995_v48, %v1023_v6  ;;  %v1040_v12 = vsel %vm999_vm4, %v1032_v8, 0.0 }
 0x1a7   : > { %1044 = vadd.xlane.f32.xlu0 %v1043_v5  ;;  %1041 = vadd.xlane.f32.xlu1 %v1040_v12  ;;  %v1036_v15 = vmul.f32 %v5075_v11, %v5075_v11 }
 0x1a8   : > { %v1035_v14 = vmul.f32 %v5073_v10, %v5073_v10 }
 0x1a9   : > { %v1052_v17 = vsel %vm999_vm4, %v1036_v15, 0.0 }
 0x1aa   : > { %v1049_v16 = vsel %vm999_vm4, %v1035_v14, 0.0 }
 0x1ab   : > { %1047 = vadd.xlane.f32.xlu1 %v1046_v13  ;;  %1050 = vadd.xlane.f32.xlu0 %v1049_v16 }
 0x1af   : > { %1053 = vadd.xlane.f32.xlu1 %v1052_v17 }
 0x230   : > { %v1039_v24 = vpop.xlane.xlu0 %1038 }
 0x231   : > { %v1055_v25 = vmul.f32 0.03125, %v1039_v24 }
 0x233   : > { %v1061_v26 = vadd.f32 1e-05, %v1055_v25 }
 0x234   : > { %v1042_v27 = vpop.xlane.xlu1 %1041  ;;  %v1045_v28 = vpop.xlane.xlu0 %1044 }
 0x235   : > { %4634 = vrsqrt.f32 %v1061_v26  ;;  %v1056_v29 = vmul.f32 0.03125, %v1042_v27  ;;  %v1057_v30 = vmul.f32 0.03125, %v1045_v28  ;;  %v5171_v27 = vld [vmem:[%s5813_s6 + $0x8] sm:$0xff] }
 0x237   : > { %v1062_v31 = vadd.f32 1e-05, %v1056_v29  ;;  %v1063_v32 = vadd.f32 1e-05, %v1057_v30  ;;  %v5176_v30 = vld [vmem:[%s5813_s6] sm:$0xff] }
 0x238   : > { %v1048_v33 = vpop.xlane.xlu1 %1047  ;;  %v1051_v34 = vpop.xlane.xlu0 %1050 }
 0x239   : > { %4636 = vrsqrt.f32 %v1062_v31  ;;  %v1058_v35 = vmul.f32 0.03125, %v1048_v33  ;;  %v1059_v36 = vmul.f32 0.03125, %v1051_v34 }
 0x23a   : > { %4638 = vrsqrt.f32 %v1063_v32 }
 0x23b   : > { %v1064_v37 = vadd.f32 1e-05, %v1058_v35  ;;  %v1065_v38 = vadd.f32 1e-05, %v1059_v36  ;;  %v5183_v35 = vld [vmem:[%s5813_s6 + $0x18] sm:$0xff] }
 0x23c   : > { %v1054_v39 = vpop.xlane.xlu1 %1053 }
 0x23d   : > { %4640 = vrsqrt.f32 %v1064_v37  ;;  %v1060_v40 = vmul.f32 0.03125, %v1054_v39 }
 0x23e   : > { %4642 = vrsqrt.f32 %v1065_v38 }
 0x23f   : > { %v4635_v41 = vpop.eup %4634  ;;  %v1066_v42 = vadd.f32 1e-05, %v1060_v40 }
 0x240   : > { %v1073_v44 = vmul.f32 %v4635_v41, %v5055_v56  ;;  %v5190_v41 = vld [vmem:[%s5813_s6 + $0x10] sm:$0xff] }
 0x241   : > { %4644 = vrsqrt.f32 %v1066_v42 }
 0x242   : > { %v1085_v46 = vmul.f32 %v3740_v43, %v1073_v44 }
 0x243   : > { %v4637_v47 = vpop.eup %4636 }
 0x244   : > { %v4639_v48 = vpop.eup %4638  ;;  %v1097_v49 = vadd.f32 %v3741_v45, %v1085_v46  ;;  %v1074_v50 = vmul.f32 %v4637_v47, %v5063_v0 }
 0x245   : > { %v1075_v51 = vmul.f32 %v4639_v48, %v5057_v57  ;;  %v5198_v48 = vld [vmem:[%s5813_s6 + $0x20] sm:$0xff] }
 0x246   : > { %4039 = vmatprep.mubr.msk.f32.mxu0 %vm999_vm4, %v1097_v49  ;;  %v1086_v52 = vmul.f32 %v3740_v43, %v1074_v50  ;;  %v5203_v50 = vld [vmem:[%s5813_s6 + $0x28] sm:$0xff] }
 0x247   : > { %v4641_v53 = vpop.eup %4640  ;;  %v1087_v54 = vmul.f32 %v3740_v43, %v1075_v51 }
 0x248   : > { %v4643_v55 = vpop.eup %4642  ;;  %v1098_v56 = vadd.f32 %v3741_v45, %v1086_v52  ;;  %v1076_v58 = vmul.f32 %v4641_v53, %v5065_v1 }
 0x249   : > { %v1099_v59 = vadd.f32 %v3741_v45, %v1087_v54  ;;  %v1077_v60 = vmul.f32 %v4643_v55, %v5073_v10 }
 0x24a   : > { %4040 = vmatmul.mubr.msk.f32.vlgmr.msra.gmra.mrb[0].mxu0 %vm999_vm4, %v1098_v56  ;;  %v1088_v61 = vmul.f32 %v3740_v43, %v1076_v58 }
 0x24b   : > { %v4645_v62 = vpop.eup %4644  ;;  %4042 = vmatprep.mubr.msk.f32.mxu0 %vm999_vm4, %v1099_v59  ;;  %v1089_v63 = vmul.f32 %v3740_v43, %v1077_v60 }
 0x24c   : > { %v1100_v57 = vadd.f32 %v3741_v45, %v1088_v61  ;;  %v1078_v0 = vmul.f32 %v4645_v62, %v5075_v11 }
 0x24d   : > { %v1101_v2 = vadd.f32 %v3741_v45, %v1089_v63 }
 0x24e   : > { %4043 = vmatmul.mubr.msk.f32.gmra.mrb[2].mxu0 %vm999_vm4, %v1100_v57  ;;  %v1090_v3 = vmul.f32 %v3740_v43, %v1078_v0 }
 0x24f   : > { %4045 = vmatprep.mubr.msk.f32.mxu0 %vm999_vm4, %v1101_v2 }
 0x250   : > { %v1102_v1 = vadd.f32 %v3741_v45, %v1090_v3 }
 0x252   : > { %4046 = vmatmul.mubr.msk.f32.gmra.mrb[4].mxu0 %vm999_vm4, %v1102_v1 }
 0x31d   : > { %v5111_v4 = vpop.f32.mrb[0].mxu0 }
 0x31e   : > { %v5113_v5 = vpop.f32.mrb[1].mxu0 }
 0x31f   : > { %4060 = vmatprep.mubr.msk.f32.mxu1 %vm1244_vm5, %v5113_v5  ;;  %v5119_v6 = vpack.i.bf16 %v5111_v4, %v5113_v5 }
 0x321   : > { %4515 = vrot.lane.b32.xlu0 %v5119_v6, %s4812_s0  ;;  %v5122_v7 = vpop.f32.mrb[2].mxu0 }
 0x322   : > { %v5124_v8 = vpop.f32.mrb[3].mxu0 }
 0x323   : > { %v5128_v9 = vpack.i.bf16 %v5122_v7, %v5124_v8 }
 0x325   : > { %4520 = vrot.lane.b32.xlu1 %v5128_v9, %s4812_s0  ;;  %v5131_v10 = vpop.f32.mrb[4].mxu0 }
 0x326   : > { %v5133_v11 = vpop.f32.mrb[5].mxu0 }
 0x327   : > { %v5137_v12 = vpack.i.bf16 %v5131_v10, %v5133_v11 }
 0x329   : > { %4525 = vrot.lane.b32.xlu1 %v5137_v12, %s4812_s0  ;;  %s4820_s0 = smov 72  }
 0x393   : > { %v4516_v13 = vpop.permute.xlu0 %4515 }
 0x394   : > { %v4518_v14 = vunpack.i.h.bf16 %v4516_v13  ;;  %v4517_v15 = vunpack.i.l.bf16 %v4516_v13 }
 0x396   : > { %v4313_v17 = vpack.c.bf16 %v4518_v14, %v4517_v15 }
 0x397   : > { %v4521_v18 = vpop.permute.xlu1 %4520 }
 0x398   : > { %v4523_v19 = vunpack.i.h.bf16 %v4521_v18  ;;  %v4522_v20 = vunpack.i.l.bf16 %v4521_v18  ;;  %4315 = vmatprep.subr.msk.bf16.mxu1 %vm5142_vm6, %v4313_v17 }
 0x399   : > { %4318 = vmatpush3.bf16.xpose.msk.msra.mxu1 %vm5142_vm6, %v4313_v17 }
 0x39a   : > { %v4319_v21 = vpack.c.bf16 %v4523_v19, %v4522_v20 }
 0x39b   : > { %v4526_v22 = vpop.permute.xlu1 %4525 }
 0x39c   : > { %v4528_v23 = vunpack.i.h.bf16 %v4526_v22  ;;  %v4527_v24 = vunpack.i.l.bf16 %v4526_v22  ;;  %4321 = vmatprep.subr.msk.bf16.mxu1 %vm5142_vm6, %v4319_v21 }
 0x39e   : > { %v4325_v25 = vpack.c.bf16 %v4528_v23, %v4527_v24 }
 0x3a1   : > { %4324 = vmatpush3.bf16.xpose.msk.msra.mxu1 %vm5142_vm6, %v4319_v21 }
 0x3a2   : > { %4327 = vmatprep.subr.msk.bf16.mxu1 %vm5142_vm6, %v4325_v25 }
 0x3a9   : > { %4330 = vmatpush3.bf16.xpose.msk.msra.mxu1 %vm5142_vm6, %v4325_v25 }
 0x3b0   : > { %4061 = vmatmul.mubr.msk.f32.vlgmr.msra.gmra.mrb[0].mxu1 %vm1244_vm5, %v5111_v4 }
 0x3b1   : > { %4063 = vmatprep.mubr.msk.f32.mxu1 %vm1244_vm5, %v5124_v8 }
 0x3b4   : > { %4064 = vmatmul.mubr.msk.f32.gmra.mrb[2].mxu1 %vm1244_vm5, %v5122_v7 }
 0x3b5   : > { %4066 = vmatprep.mubr.msk.f32.mxu1 %vm1244_vm5, %v5133_v11 }
 0x3b8   : > { %4067 = vmatmul.mubr.msk.f32.gmra.mrb[4].mxu1 %vm1244_vm5, %v5131_v10 }
 0x483   : > { %v4062_v26 = vpop.f32.mrb[0].mxu1 }
 0x484   : > { %v1365_v28 = vmul.f32 0.35355338, %v4062_v26  ;;  %v1335_v29 = vpop.f32.mrb[1].mxu1 }
 0x485   : > { %v1364_v31 = vmul.f32 0.35355338, %v1335_v29 }
 0x486   : > { %v1371_v32 = vadd.f32 %v1365_v28, %v5171_v27 }
 0x487   : > { %v4065_v33 = vpop.f32.mrb[2].mxu1  ;;  %v1370_v34 = vadd.f32 %v1364_v31, %v5176_v30 }
 0x488   : > { %v1367_v36 = vmul.f32 0.35355338, %v4065_v33  ;;  %v1345_v37 = vpop.f32.mrb[3].mxu1  ;;  %v1380_v38 = vsel %vm1376_vm7, %v1371_v32, -inf }
 0x489   : > { %v1366_v39 = vmul.f32 0.35355338, %v1345_v37  ;;  %1381 = vmax.xlane.f32.xlu0 %v1380_v38  ;;  %v1377_v40 = vsel %vm1376_vm7, %v1370_v34, -inf }
 0x48a   : > { %1378 = vmax.xlane.f32.xlu1 %v1377_v40  ;;  %v1373_v42 = vadd.f32 %v1367_v36, %v5183_v35 }
 0x48b   : > { %v4068_v43 = vpop.f32.mrb[4].mxu1  ;;  %v1372_v47 = vadd.f32 %v1366_v39, %v5190_v41 }
 0x48c   : > { %v1369_v44 = vmul.f32 0.35355338, %v4068_v43  ;;  %v1355_v45 = vpop.f32.mrb[5].mxu1  ;;  %v1386_v46 = vsel %vm1376_vm7, %v1373_v42, -inf }
 0x48d   : > { %v1368_v49 = vmul.f32 0.35355338, %v1355_v45  ;;  %1387 = vmax.xlane.f32.xlu0 %v1386_v46  ;;  %v1383_v52 = vsel %vm1376_vm7, %v1372_v47, -inf }
 0x48e   : > { %v1375_v53 = vadd.f32 %v1369_v44, %v5203_v50 }
 0x48f   : > { %v1374_v51 = vadd.f32 %v1368_v49, %v5198_v48 }
 0x490   : > { %v1392_v55 = vsel %vm1376_vm7, %v1375_v53, -inf }
 0x491   : > { %1384 = vmax.xlane.f32.xlu0 %v1383_v52  ;;  %v1389_v54 = vsel %vm1376_vm7, %v1374_v51, -inf }
 0x492   : > { %1390 = vmax.xlane.f32.xlu1 %v1389_v54 }
 0x495   : > { %1393 = vmax.xlane.f32.xlu0 %v1392_v55 }
 0x4a3   : > { %4530 = vrot.lane.b32.xlu1 %v5119_v6, %s4813_s25 }
 0x4a7   : > { %4540 = vrot.lane.b32.xlu1 %v5137_v12, %s4813_s25 }
 0x4ab   : > { %4535 = vrot.lane.b32.xlu0 %v5128_v9, %s4813_s25 }
 0x516   : > { %v1382_v56 = vpop.xlane.xlu0 %1381 }
 0x517   : > { %v1396_v58 = vsub.f32 %v1371_v32, %v1382_v56  ;;  %v1379_v59 = vpop.xlane.xlu1 %1378 }
 0x518   : > { %v1395_v60 = vsub.f32 %v1370_v34, %v1379_v59 }
 0x519   : > { %v1403_v61 = vmul.f32 1.442695, %v1396_v58 }
 0x51a   : > { %v1401_v62 = vmul.f32 1.442695, %v1395_v60  ;;  %v1388_v63 = vpop.xlane.xlu0 %1387 }
 0x51b   : > { %4646 = vpow2.f32 %v1403_v61  ;;  %v1398_v57 = vsub.f32 %v1373_v42, %v1388_v63 }
 0x51c   : > { %4648 = vpow2.f32 %v1401_v62 }
 0x51d   : > { %v1407_v0 = vmul.f32 1.442695, %v1398_v57 }
 0x51e   : > { %v1385_v2 = vpop.xlane.xlu0 %1384 }
 0x51f   : > { %4650 = vpow2.f32 %v1407_v0  ;;  %v1397_v3 = vsub.f32 %v1372_v47, %v1385_v2  ;;  %v1391_v1 = vpop.xlane.xlu1 %1390 }
 0x520   : > { %v1399_v14 = vsub.f32 %v1374_v51, %v1391_v1 }
 0x521   : > { %v1405_v13 = vmul.f32 1.442695, %v1397_v3 }
 0x522   : > { %v1394_v15 = vpop.xlane.xlu0 %1393  ;;  %v1409_v22 = vmul.f32 1.442695, %v1399_v14 }
 0x523   : > { %4652 = vpow2.f32 %v1405_v13  ;;  %v1400_v17 = vsub.f32 %v1375_v53, %v1394_v15  ;;  %v4531_v18 = vpop.permute.xlu1 %4530 }
 0x524   : > { %v4533_v19 = vunpack.i.h.bf16 %v4531_v18  ;;  %v4532_v20 = vunpack.i.l.bf16 %v4531_v18 }
 0x525   : > { %v4647_v21 = vpop.eup %4646  ;;  %v1411_v23 = vmul.f32 1.442695, %v1400_v17 }
 0x526   : > { %v4649_v24 = vpop.eup %4648  ;;  %v4536_v25 = vpop.permute.xlu0 %4535  ;;  %v1416_v26 = vsel %vm1376_vm7, %v4647_v21, 0.0  ;;  %v4331_v28 = vpack.c.bf16 %v4533_v19, %v4532_v20 }
 0x527   : > { %4654 = vpow2.f32 %v1411_v23  ;;  %v4538_v29 = vunpack.i.h.bf16 %v4536_v25  ;;  %v4537_v31 = vunpack.i.l.bf16 %v4536_v25  ;;  %1417 = vadd.xlane.f32.xlu0 %v1416_v26  ;;  %v4541_v32 = vpop.permute.xlu1 %4540  ;;  %v1413_v33 = vsel %vm1376_vm7, %v4649_v24, 0.0 }
 0x528   : > { %v4543_v34 = vunpack.i.h.bf16 %v4541_v32  ;;  %v4542_v36 = vunpack.i.l.bf16 %v4541_v32  ;;  %1414 = vadd.xlane.f32.xlu1 %v1413_v33  ;;  %4332 = vmatprep.subr.bf16.mxu0 %v4331_v28  ;;  %4656 = vpow2.f32 %v1409_v22 }
 0x529   : > { %v4651_v37 = vpop.eup %4650  ;;  %4334 = vmatpush3.bf16.msra.mxu0 %v4331_v28  ;;  %v4335_v38 = vpack.c.bf16 %v4538_v29, %v4537_v31 }
 0x52a   : > { %v1422_v39 = vsel %vm1376_vm7, %v4651_v37, 0.0  ;;  %v4339_v40 = vpack.c.bf16 %v4543_v34, %v4542_v36 }
 0x52b   : > { %1423 = vadd.xlane.f32.xlu0 %v1422_v39  ;;  %4336 = vmatprep.subr.bf16.mxu0 %v4335_v38 }
 0x52d   : > { %v4653_v42 = vpop.eup %4652  ;;  %4338 = vmatpush3.bf16.msra.mxu0 %v4335_v38 }
 0x52e   : > { %4340 = vmatprep.subr.bf16.mxu0 %v4339_v40  ;;  %v1419_v43 = vsel %vm1376_vm7, %v4653_v42, 0.0 }
 0x52f   : > { %1420 = vadd.xlane.f32.xlu1 %v1419_v43 }
 0x531   : > { %v4655_v44 = vpop.eup %4654  ;;  %4342 = vmatpush3.bf16.msra.mxu0 %v4339_v40 }
 0x532   : > { %v1428_v45 = vsel %vm1376_vm7, %v4655_v44, 0.0  ;;  %v4657_v46 = vpop.eup %4656 }
 0x533   : > { %1429 = vadd.xlane.f32.xlu0 %v1428_v45  ;;  %v1425_v47 = vsel %vm1376_vm7, %v4657_v46, 0.0 }
 0x537   : > { %1426 = vadd.xlane.f32.xlu0 %v1425_v47 }
 0x540   : > { %4550 = vrot.lane.b32.xlu1 %v5128_v9, %s4814_s18 }
 0x544   : > { %4555 = vrot.lane.b32.xlu1 %v5137_v12, %s4814_s18 }
 0x548   : > { %1574 = vrot.lane.b32.xlu1 %v5113_v5, %s4815_s30 }
 0x54c   : > { %1576 = vrot.lane.b32.xlu1 %v5111_v4, %s4815_s30 }
 0x54d   : > { %4545 = vrot.lane.b32.xlu0 %v5119_v6, %s4814_s18  ;;  %s4822_s18 = smov 40  }
 0x550   : > { %1578 = vrot.lane.b32.xlu1 %v5124_v8, %s4815_s30 }
 0x551   : > { %1580 = vrot.lane.b32.xlu0 %v5122_v7, %s4815_s30 }
 0x554   : > { %1582 = vrot.lane.b32.xlu1 %v5133_v11, %s4815_s30 }
 0x555   : > { %1584 = vrot.lane.b32.xlu0 %v5131_v10, %s4815_s30  ;;  %s4823_s30 = smov 8  }
 0x5b4   : > { %v1418_v49 = vpop.xlane.xlu0 %1417 }
 0x5b5   : > { %4658 = vrcp.f32 %v1418_v49  ;;  %v1415_v51 = vpop.xlane.xlu1 %1414 }
 0x5b6   : > { %4660 = vrcp.f32 %v1415_v51 }
 0x5b8   : > { %v1424_v52 = vpop.xlane.xlu0 %1423 }
 0x5b9   : > { %4662 = vrcp.f32 %v1424_v52 }
 0x5bc   : > { %v1421_v53 = vpop.xlane.xlu1 %1420 }
 0x5bd   : > { %4664 = vrcp.f32 %v1421_v53 }
 0x5bf   : > { %v4659_v54 = vpop.eup %4658 }
 0x5c0   : > { %v4661_v55 = vpop.eup %4660  ;;  %v1430_v56 = vpop.xlane.xlu0 %1429  ;;  %v1438_v59 = vmul.f32 %v4659_v54, %v4647_v21 }
 0x5c1   : > { %v1437_v58 = vmul.f32 %v4661_v55, %v4649_v24  ;;  %4666 = vrcp.f32 %v1430_v56  ;;  %v4551_v61 = vpop.permute.xlu1 %4550 }
 0x5c2   : > { %v4553_v57 = vunpack.i.h.bf16 %v4551_v61  ;;  %v4552_v3 = vunpack.i.l.bf16 %v4551_v61 }
 0x5c3   : > { %4081 = vmatprep.mubr.msk.f32.mxu0 %vm1376_vm7, %v1437_v58  ;;  %v4663_v62 = vpop.eup %4662 }
 0x5c4   : > { %v1427_v60 = vpop.xlane.xlu0 %1426  ;;  %4082 = vmatmul.mubr.msk.f32.vlgmr.msra.gmra.mrb[6].mxu0 %vm1376_vm7, %v1438_v59  ;;  %v1440_v14 = vmul.f32 %v4663_v62, %v4651_v37  ;;  %v4349_v17 = vpack.c.bf16 %v4553_v57, %v4552_v3 }
 0x5c5   : > { %4668 = vrcp.f32 %v1427_v60  ;;  %v4556_v18 = vpop.permute.xlu1 %4555 }
 0x5c6   : > { %v4558_v22 = vunpack.i.h.bf16 %v4556_v18  ;;  %v4557_v23 = vunpack.i.l.bf16 %v4556_v18 }
 0x5c7   : > { %v4665_v63 = vpop.eup %4664 }
 0x5c8   : > { %v4546_v0 = vpop.permute.xlu0 %4545  ;;  %v1439_v2 = vmul.f32 %v4665_v63, %v4653_v42  ;;  %v4355_v26 = vpack.c.bf16 %v4558_v22, %v4557_v23 }
 0x5c9   : > { %v4548_v1 = vunpack.i.h.bf16 %v4546_v0  ;;  %v4547_v13 = vunpack.i.l.bf16 %v4546_v0  ;;  %v1575_v25 = vpop.permute.xlu1 %1574 }
 0x5ca   : > { %4084 = vmatprep.mubr.msk.f32.mxu0 %vm1376_vm7, %v1439_v2 }
 0x5cb   : > { %v4343_v15 = vpack.c.bf16 %v4548_v1, %v4547_v13  ;;  %4085 = vmatmul.mubr.msk.f32.gmra.mrb[8].mxu0 %vm1376_vm7, %v1440_v14  ;;  %v4667_v19 = vpop.eup %4666 }
 0x5cc   : > { %v1442_v24 = vmul.f32 %v4667_v19, %v4655_v44  ;;  %v1581_v31 = vpop.permute.xlu0 %1580 }
 0x5cd   : > { %4345 = vmatprep.subr.msk.bf16.mxu0 %vm5142_vm6, %v4343_v15  ;;  %v1577_v28 = vpop.permute.xlu1 %1576 }
 0x5ce   : > { %4348 = vmatpush3.bf16.xpose.msk.msra.mxu0 %vm5142_vm6, %v4343_v15 }
 0x5cf   : > { %v4669_v20 = vpop.eup %4668  ;;  %4351 = vmatprep.subr.msk.bf16.mxu0 %vm5142_vm6, %v4349_v17 }
 0x5d0   : > { %v1441_v21 = vmul.f32 %v4669_v20, %v4657_v46  ;;  %v1585_v33 = vpop.permute.xlu0 %1584 }
 0x5d1   : > { %v1579_v29 = vpop.permute.xlu1 %1578 }
 0x5d2   : > { %4087 = vmatprep.mubr.msk.f32.mxu0 %vm1376_vm7, %v1441_v21 }
 0x5d3   : > { %4088 = vmatmul.mubr.msk.f32.gmra.mrb[10].mxu0 %vm1376_vm7, %v1442_v24 }
 0x5d4   : > { %4102 = vmatprep.mubr.msk.f32.mxu0 %vm1244_vm5, %v1575_v25 }
 0x5d5   : > { %v1583_v32 = vpop.permute.xlu1 %1582 }
 0x5d6   : > { %4354 = vmatpush3.bf16.xpose.msk.msra.mxu0 %vm5142_vm6, %v4349_v17 }
 0x5d7   : > { %4357 = vmatprep.subr.msk.bf16.mxu0 %vm5142_vm6, %v4355_v26 }
 0x5de   : > { %4360 = vmatpush3.bf16.xpose.msk.msra.mxu0 %vm5142_vm6, %v4355_v26 }
 0x5e5   : > { %4103 = vmatmul.mubr.msk.f32.vlgmr.msra.gmra.mrb[12].mxu0 %vm1244_vm5, %v1577_v28 }
 0x5e6   : > { %4105 = vmatprep.mubr.msk.f32.mxu0 %vm1244_vm5, %v1579_v29 }
 0x5e9   : > { %4106 = vmatmul.mubr.msk.f32.gmra.mrb[14].mxu0 %vm1244_vm5, %v1581_v31 }
 0x5ea   : > { %4108 = vmatprep.mubr.msk.f32.mxu0 %vm1244_vm5, %v1583_v32 }
 0x5ed   : > { %4109 = vmatmul.mubr.msk.f32.gmra.mrb[16].mxu0 %vm1244_vm5, %v1585_v33 }
 0x697   : > { %v5252_v34 = vpop.f32.mrb[6].mxu0 }
 0x698   : > { %v5254_v36 = vpop.f32.mrb[7].mxu0 }
 0x69e   : > { %v5256_v37 = vpop.f32.mrb[8].mxu0 }
 0x69f   : > { %v5258_v38 = vpop.f32.mrb[9].mxu0 }
 0x6a6   : > { %v5260_v39 = vpop.f32.mrb[10].mxu0 }
 0x6a7   : > { %v5262_v40 = vpop.f32.mrb[11].mxu0 }
 0x6b8   : > { %v4104_v42 = vpop.f32.mrb[12].mxu0 }
 0x6b9   : > { %v1718_v43 = vmul.f32 0.35355338, %v4104_v42  ;;  %v1688_v44 = vpop.f32.mrb[13].mxu0 }
 0x6ba   : > { %v1717_v45 = vmul.f32 0.35355338, %v1688_v44 }
 0x6bb   : > { %v1724_v46 = vadd.f32 %v1718_v43, %v5171_v27 }
 0x6bc   : > { %v4107_v47 = vpop.f32.mrb[14].mxu0  ;;  %v1723_v49 = vadd.f32 %v1717_v45, %v5176_v30 }
 0x6bd   : > { %v1720_v51 = vmul.f32 0.35355338, %v4107_v47  ;;  %v1698_v52 = vpop.f32.mrb[15].mxu0  ;;  %v1732_v53 = vsel %vm1376_vm7, %v1724_v46, -inf }
 0x6be   : > { %v1719_v54 = vmul.f32 0.35355338, %v1698_v52  ;;  %1733 = vmax.xlane.f32.xlu0 %v1732_v53  ;;  %v1729_v55 = vsel %vm1376_vm7, %v1723_v49, -inf }
 0x6bf   : > { %1730 = vmax.xlane.f32.xlu1 %v1729_v55  ;;  %v1726_v56 = vadd.f32 %v1720_v51, %v5183_v35 }
 0x6c0   : > { %v4110_v58 = vpop.f32.mrb[16].mxu0  ;;  %v1725_v62 = vadd.f32 %v1719_v54, %v5190_v41 }
 0x6c1   : > { %v1722_v59 = vmul.f32 0.35355338, %v4110_v58  ;;  %v1708_v60 = vpop.f32.mrb[17].mxu0  ;;  %v1738_v61 = vsel %vm1376_vm7, %v1726_v56, -inf }
 0x6c2   : > { %v1721_v63 = vmul.f32 0.35355338, %v1708_v60  ;;  %1739 = vmax.xlane.f32.xlu0 %v1738_v61  ;;  %v1735_v0 = vsel %vm1376_vm7, %v1725_v62, -inf }
 0x6c3   : > { %v1728_v2 = vadd.f32 %v1722_v59, %v5203_v50 }
 0x6c4   : > { %v1727_v57 = vadd.f32 %v1721_v63, %v5198_v48 }
 0x6c5   : > { %v1744_v1 = vsel %vm1376_vm7, %v1728_v2, -inf }
 0x6c6   : > { %1736 = vmax.xlane.f32.xlu0 %v1735_v0  ;;  %v1741_v3 = vsel %vm1376_vm7, %v1727_v57, -inf }
 0x6c7   : > { %1742 = vmax.xlane.f32.xlu1 %v1741_v3 }
 0x6ca   : > { %1745 = vmax.xlane.f32.xlu0 %v1744_v1 }
 0x6d8   : > { %4560 = vrot.lane.b32.xlu1 %v5119_v6, %s4816_s27 }
 0x6dc   : > { %4570 = vrot.lane.b32.xlu1 %v5137_v12, %s4816_s27 }
 0x6e0   : > { %4565 = vrot.lane.b32.xlu0 %v5128_v9, %s4816_s27  ;;  %s4824_s27 = smov 16  }
 0x74b   : > { %v1734_v13 = vpop.xlane.xlu0 %1733 }
 0x74c   : > { %v1748_v14 = vsub.f32 %v1724_v46, %v1734_v13  ;;  %v1731_v15 = vpop.xlane.xlu1 %1730 }
 0x74d   : > { %v1747_v17 = vsub.f32 %v1723_v49, %v1731_v15 }
 0x74e   : > { %v1755_v18 = vmul.f32 1.442695, %v1748_v14 }
 0x74f   : > { %v1753_v19 = vmul.f32 1.442695, %v1747_v17  ;;  %v1740_v20 = vpop.xlane.xlu0 %1739 }
 0x750   : > { %4670 = vpow2.f32 %v1755_v18  ;;  %v1750_v21 = vsub.f32 %v1726_v56, %v1740_v20 }
 0x751   : > { %4672 = vpow2.f32 %v1753_v19 }
 0x752   : > { %v1759_v22 = vmul.f32 1.442695, %v1750_v21 }
 0x753   : > { %v1737_v23 = vpop.xlane.xlu0 %1736 }
 0x754   : > { %4674 = vpow2.f32 %v1759_v22  ;;  %v1749_v24 = vsub.f32 %v1725_v62, %v1737_v23  ;;  %v1743_v25 = vpop.xlane.xlu1 %1742 }
 0x755   : > { %v1751_v28 = vsub.f32 %v1727_v57, %v1743_v25 }
 0x756   : > { %v1757_v26 = vmul.f32 1.442695, %v1749_v24 }
 0x757   : > { %v1746_v29 = vpop.xlane.xlu0 %1745  ;;  %v1761_v44 = vmul.f32 1.442695, %v1751_v28 }
 0x758   : > { %4676 = vpow2.f32 %v1757_v26  ;;  %v1752_v31 = vsub.f32 %v1728_v2, %v1746_v29  ;;  %v4561_v32 = vpop.permute.xlu1 %4560 }
 0x759   : > { %v4563_v33 = vunpack.i.h.bf16 %v4561_v32  ;;  %v4562_v42 = vunpack.i.l.bf16 %v4561_v32 }
 0x75a   : > { %v4671_v43 = vpop.eup %4670  ;;  %v1763_v45 = vmul.f32 1.442695, %v1752_v31 }
 0x75b   : > { %v4673_v46 = vpop.eup %4672  ;;  %v4361_v47 = vpack.c.bf16 %v4563_v33, %v4562_v42  ;;  %v4566_v49 = vpop.permute.xlu0 %4565  ;;  %v1768_v51 = vsel %vm1376_vm7, %v4671_v43, 0.0 }
 0x75c   : > { %4678 = vpow2.f32 %v1763_v45  ;;  %v4568_v52 = vunpack.i.h.bf16 %v4566_v49  ;;  %v4567_v53 = vunpack.i.l.bf16 %v4566_v49  ;;  %1769 = vadd.xlane.f32.xlu0 %v1768_v51  ;;  %v4571_v54 = vpop.permute.xlu1 %4570  ;;  %v1765_v55 = vsel %vm1376_vm7, %v4673_v46, 0.0 }
 0x75d   : > { %v4573_v56 = vunpack.i.h.bf16 %v4571_v54  ;;  %v4572_v58 = vunpack.i.l.bf16 %v4571_v54  ;;  %1766 = vadd.xlane.f32.xlu1 %v1765_v55  ;;  %4362 = vmatprep.subr.bf16.mxu1 %v4361_v47  ;;  %4680 = vpow2.f32 %v1761_v44 }
 0x75e   : > { %v4675_v59 = vpop.eup %4674  ;;  %v4365_v60 = vpack.c.bf16 %v4568_v52, %v4567_v53  ;;  %4364 = vmatpush3.bf16.msra.mxu1 %v4361_v47 }
 0x75f   : > { %v1774_v61 = vsel %vm1376_vm7, %v4675_v59, 0.0  ;;  %v4369_v62 = vpack.c.bf16 %v4573_v56, %v4572_v58 }
 0x760   : > { %1775 = vadd.xlane.f32.xlu0 %v1774_v61  ;;  %4366 = vmatprep.subr.bf16.mxu1 %v4365_v60 }
 0x762   : > { %v4677_v63 = vpop.eup %4676  ;;  %4368 = vmatpush3.bf16.msra.mxu1 %v4365_v60 }
 0x763   : > { %4370 = vmatprep.subr.bf16.mxu1 %v4369_v62  ;;  %v1771_v57 = vsel %vm1376_vm7, %v4677_v63, 0.0 }
 0x764   : > { %1772 = vadd.xlane.f32.xlu1 %v1771_v57 }
 0x766   : > { %v4679_v0 = vpop.eup %4678  ;;  %4372 = vmatpush3.bf16.msra.mxu1 %v4369_v62 }
 0x767   : > { %v1780_v2 = vsel %vm1376_vm7, %v4679_v0, 0.0  ;;  %v4681_v3 = vpop.eup %4680 }
 0x768   : > { %1781 = vadd.xlane.f32.xlu0 %v1780_v2  ;;  %v1777_v1 = vsel %vm1376_vm7, %v4681_v3, 0.0 }
 0x76c   : > { %1778 = vadd.xlane.f32.xlu0 %v1777_v1 }
 0x775   : > { %4580 = vrot.lane.b32.xlu1 %v5128_v9, %s4817_s3 }
 0x779   : > { %4585 = vrot.lane.b32.xlu1 %v5137_v12, %s4817_s3 }
 0x77d   : > { %1926 = vrot.lane.b32.xlu1 %v5113_v5, %s4818_s4 }
 0x781   : > { %1928 = vrot.lane.b32.xlu1 %v5111_v4, %s4818_s4 }
 0x782   : > { %4575 = vrot.lane.b32.xlu0 %v5119_v6, %s4817_s3  ;;  %s4825_s3 = smov 24  }
 0x785   : > { %1930 = vrot.lane.b32.xlu1 %v5124_v8, %s4818_s4 }
 0x786   : > { %1932 = vrot.lane.b32.xlu0 %v5122_v7, %s4818_s4 }
 0x789   : > { %1934 = vrot.lane.b32.xlu1 %v5133_v11, %s4818_s4 }
 0x78a   : > { %1936 = vrot.lane.b32.xlu0 %v5131_v10, %s4818_s4 }
 0x7e9   : > { %v1770_v13 = vpop.xlane.xlu0 %1769 }
 0x7ea   : > { %4682 = vrcp.f32 %v1770_v13  ;;  %v1767_v14 = vpop.xlane.xlu1 %1766 }
 0x7eb   : > { %4684 = vrcp.f32 %v1767_v14 }
 0x7ed   : > { %v1776_v15 = vpop.xlane.xlu0 %1775 }
 0x7ee   : > { %4686 = vrcp.f32 %v1776_v15 }
 0x7f1   : > { %v1773_v17 = vpop.xlane.xlu1 %1772 }
 0x7f2   : > { %4688 = vrcp.f32 %v1773_v17 }
 0x7f4   : > { %v4683_v18 = vpop.eup %4682 }
 0x7f5   : > { %v4685_v19 = vpop.eup %4684  ;;  %v1782_v20 = vpop.xlane.xlu0 %1781  ;;  %v1790_v22 = vmul.f32 %v4683_v18, %v4671_v43 }
 0x7f6   : > { %v1789_v21 = vmul.f32 %v4685_v19, %v4673_v46  ;;  %4690 = vrcp.f32 %v1782_v20  ;;  %v4581_v24 = vpop.permute.xlu1 %4580 }
 0x7f7   : > { %v4583_v28 = vunpack.i.h.bf16 %v4581_v24  ;;  %v4582_v32 = vunpack.i.l.bf16 %v4581_v24 }
 0x7f8   : > { %4123 = vmatprep.mubr.msk.f32.mxu1 %vm1376_vm7, %v1789_v21  ;;  %v4687_v25 = vpop.eup %4686 }
 0x7f9   : > { %v1779_v23 = vpop.xlane.xlu0 %1778  ;;  %4124 = vmatmul.mubr.msk.f32.vlgmr.msra.gmra.mrb[6].mxu1 %vm1376_vm7, %v1790_v22  ;;  %v1792_v44 = vmul.f32 %v4687_v25, %v4675_v59  ;;  %v4379_v45 = vpack.c.bf16 %v4583_v28, %v4582_v32 }
 0x7fa   : > { %4692 = vrcp.f32 %v1779_v23  ;;  %v4586_v46 = vpop.permute.xlu1 %4585 }
 0x7fb   : > { %v4588_v52 = vunpack.i.h.bf16 %v4586_v46  ;;  %v4587_v53 = vunpack.i.l.bf16 %v4586_v46 }
 0x7fc   : > { %v4689_v26 = vpop.eup %4688 }
 0x7fd   : > { %v4576_v29 = vpop.permute.xlu0 %4575  ;;  %v1791_v31 = vmul.f32 %v4689_v26, %v4677_v63  ;;  %v4385_v56 = vpack.c.bf16 %v4588_v52, %v4587_v53 }
 0x7fe   : > { %v4578_v33 = vunpack.i.h.bf16 %v4576_v29  ;;  %v4577_v42 = vunpack.i.l.bf16 %v4576_v29  ;;  %v1927_v55 = vpop.permute.xlu1 %1926 }
 0x7ff   : > { %4126 = vmatprep.mubr.msk.f32.mxu1 %vm1376_vm7, %v1791_v31 }
 0x800   : > { %v4373_v43 = vpack.c.bf16 %v4578_v33, %v4577_v42  ;;  %4127 = vmatmul.mubr.msk.f32.gmra.mrb[8].mxu1 %vm1376_vm7, %v1792_v44  ;;  %v4691_v47 = vpop.eup %4690 }
 0x801   : > { %v1794_v54 = vmul.f32 %v4691_v47, %v4679_v0  ;;  %v1933_v60 = vpop.permute.xlu0 %1932 }
 0x802   : > { %4375 = vmatprep.subr.msk.bf16.mxu1 %vm5142_vm6, %v4373_v43  ;;  %v1929_v58 = vpop.permute.xlu1 %1928 }
 0x803   : > { %4378 = vmatpush3.bf16.xpose.msk.msra.mxu1 %vm5142_vm6, %v4373_v43 }
 0x804   : > { %v4693_v49 = vpop.eup %4692  ;;  %4381 = vmatprep.subr.msk.bf16.mxu1 %vm5142_vm6, %v4379_v45 }
 0x805   : > { %v1793_v51 = vmul.f32 %v4693_v49, %v4681_v3  ;;  %v1937_v62 = vpop.permute.xlu0 %1936 }
 0x806   : > { %v1931_v59 = vpop.permute.xlu1 %1930 }
 0x807   : > { %4129 = vmatprep.mubr.msk.f32.mxu1 %vm1376_vm7, %v1793_v51 }
 0x808   : > { %4130 = vmatmul.mubr.msk.f32.gmra.mrb[10].mxu1 %vm1376_vm7, %v1794_v54 }
 0x809   : > { %4144 = vmatprep.mubr.msk.f32.mxu1 %vm1244_vm5, %v1927_v55 }
 0x80a   : > { %v1935_v61 = vpop.permute.xlu1 %1934 }
 0x80b   : > { %4384 = vmatpush3.bf16.xpose.msk.msra.mxu1 %vm5142_vm6, %v4379_v45 }
 0x80c   : > { %4387 = vmatprep.subr.msk.bf16.mxu1 %vm5142_vm6, %v4385_v56 }
 0x813   : > { %4390 = vmatpush3.bf16.xpose.msk.msra.mxu1 %vm5142_vm6, %v4385_v56 }
 0x81a   : > { %4145 = vmatmul.mubr.msk.f32.vlgmr.msra.gmra.mrb[12].mxu1 %vm1244_vm5, %v1929_v58 }
 0x81b   : > { %4147 = vmatprep.mubr.msk.f32.mxu1 %vm1244_vm5, %v1931_v59 }
 0x81e   : > { %4148 = vmatmul.mubr.msk.f32.gmra.mrb[14].mxu1 %vm1244_vm5, %v1933_v60 }
 0x81f   : > { %4150 = vmatprep.mubr.msk.f32.mxu1 %vm1244_vm5, %v1935_v61 }
 0x822   : > { %4151 = vmatmul.mubr.msk.f32.gmra.mrb[16].mxu1 %vm1244_vm5, %v1937_v62 }
 0x8cc   : > { %v5318_v63 = vpop.f32.mrb[6].mxu1 }
 0x8cd   : > { %v5320_v57 = vpop.f32.mrb[7].mxu1 }
 0x8d3   : > { %v5322_v0 = vpop.f32.mrb[8].mxu1 }
 0x8d4   : > { %v5324_v2 = vpop.f32.mrb[9].mxu1 }
 0x8db   : > { %v5326_v3 = vpop.f32.mrb[10].mxu1 }
 0x8dc   : > { %v5328_v1 = vpop.f32.mrb[11].mxu1 }
 0x8ed   : > { %v4146_v13 = vpop.f32.mrb[12].mxu1 }
 0x8ee   : > { %v2070_v14 = vmul.f32 0.35355338, %v4146_v13  ;;  %v2040_v15 = vpop.f32.mrb[13].mxu1 }
 0x8ef   : > { %v2069_v17 = vmul.f32 0.35355338, %v2040_v15 }
 0x8f0   : > { %v2076_v18 = vadd.f32 %v2070_v14, %v5171_v27 }
 0x8f1   : > { %v4149_v19 = vpop.f32.mrb[14].mxu1  ;;  %v2075_v20 = vadd.f32 %v2069_v17, %v5176_v30 }
 0x8f2   : > { %v2072_v21 = vmul.f32 0.35355338, %v4149_v19  ;;  %v2050_v22 = vpop.f32.mrb[15].mxu1  ;;  %v2084_v23 = vsel %vm1376_vm7, %v2076_v18, -inf }
 0x8f3   : > { %v2071_v24 = vmul.f32 0.35355338, %v2050_v22  ;;  %2085 = vmax.xlane.f32.xlu0 %v2084_v23  ;;  %v2081_v25 = vsel %vm1376_vm7, %v2075_v20, -inf }
 0x8f4   : > { %2082 = vmax.xlane.f32.xlu1 %v2081_v25  ;;  %v2078_v26 = vadd.f32 %v2072_v21, %v5183_v35 }
 0x8f5   : > { %v4152_v28 = vpop.f32.mrb[16].mxu1  ;;  %v2077_v27 = vadd.f32 %v2071_v24, %v5190_v41 }
 0x8f6   : > { %v2074_v29 = vmul.f32 0.35355338, %v4152_v28  ;;  %v2060_v31 = vpop.f32.mrb[17].mxu1  ;;  %v2090_v32 = vsel %vm1376_vm7, %v2078_v26, -inf }
 0x8f7   : > { %v2073_v33 = vmul.f32 0.35355338, %v2060_v31  ;;  %2091 = vmax.xlane.f32.xlu0 %v2090_v32  ;;  %v2087_v42 = vsel %vm1376_vm7, %v2077_v27, -inf }
 0x8f8   : > { %v2080_v44 = vadd.f32 %v2074_v29, %v5203_v50 }
 0x8f9   : > { %v2079_v30 = vadd.f32 %v2073_v33, %v5198_v48 }
 0x8fa   : > { %v2096_v35 = vsel %vm1376_vm7, %v2080_v44, -inf }
 0x8fb   : > { %2088 = vmax.xlane.f32.xlu0 %v2087_v42  ;;  %v2093_v43 = vsel %vm1376_vm7, %v2079_v30, -inf }
 0x8fc   : > { %2094 = vmax.xlane.f32.xlu1 %v2093_v43 }
 0x8ff   : > { %2097 = vmax.xlane.f32.xlu0 %v2096_v35 }
 0x90d   : > { %4590 = vrot.lane.b32.xlu1 %v5119_v6, %s4819_s21 }
 0x911   : > { %4600 = vrot.lane.b32.xlu1 %v5137_v12, %s4819_s21 }
 0x915   : > { %4595 = vrot.lane.b32.xlu0 %v5128_v9, %s4819_s21  ;;  %s5814_s21 = scalar_lea.vmem %s5770_s11, %s4957_s29 }
 0x980   : > { %v2086_v41 = vpop.xlane.xlu0 %2085 }
 0x981   : > { %v2100_v48 = vsub.f32 %v2076_v18, %v2086_v41  ;;  %v2083_v45 = vpop.xlane.xlu1 %2082 }
 0x982   : > { %v2099_v46 = vsub.f32 %v2075_v20, %v2083_v45 }
 0x983   : > { %v2107_v47 = vmul.f32 1.442695, %v2100_v48 }
 0x984   : > { %v2105_v50 = vmul.f32 1.442695, %v2099_v46  ;;  %v2092_v49 = vpop.xlane.xlu0 %2091 }
 0x985   : > { %4694 = vpow2.f32 %v2107_v47  ;;  %v2102_v51 = vsub.f32 %v2078_v26, %v2092_v49 }
 0x986   : > { %4696 = vpow2.f32 %v2105_v50 }
 0x987   : > { %v2111_v52 = vmul.f32 1.442695, %v2102_v51 }
 0x988   : > { %v2089_v53 = vpop.xlane.xlu0 %2088 }
 0x989   : > { %4698 = vpow2.f32 %v2111_v52  ;;  %v2101_v54 = vsub.f32 %v2077_v27, %v2089_v53  ;;  %v2095_v55 = vpop.xlane.xlu1 %2094 }
 0x98a   : > { %v2103_v58 = vsub.f32 %v2079_v30, %v2095_v55 }
 0x98b   : > { %v2109_v56 = vmul.f32 1.442695, %v2101_v54 }
 0x98c   : > { %v2098_v59 = vpop.xlane.xlu0 %2097  ;;  %v2113_v15 = vmul.f32 1.442695, %v2103_v58 }
 0x98d   : > { %4700 = vpow2.f32 %v2109_v56  ;;  %v2104_v60 = vsub.f32 %v2080_v44, %v2098_v59  ;;  %v4591_v61 = vpop.permute.xlu1 %4590 }
 0x98e   : > { %v4593_v62 = vunpack.i.h.bf16 %v4591_v61  ;;  %v4592_v13 = vunpack.i.l.bf16 %v4591_v61 }
 0x98f   : > { %v4695_v14 = vpop.eup %4694  ;;  %v2115_v17 = vmul.f32 1.442695, %v2104_v60 }
 0x990   : > { %v4697_v18 = vpop.eup %4696  ;;  %v4391_v19 = vpack.c.bf16 %v4593_v62, %v4592_v13  ;;  %v4596_v20 = vpop.permute.xlu0 %4595  ;;  %v2120_v21 = vsel %vm1376_vm7, %v4695_v14, 0.0 }
 0x991   : > { %4702 = vpow2.f32 %v2115_v17  ;;  %v4598_v22 = vunpack.i.h.bf16 %v4596_v20  ;;  %v4597_v23 = vunpack.i.l.bf16 %v4596_v20  ;;  %2121 = vadd.xlane.f32.xlu0 %v2120_v21  ;;  %v4601_v24 = vpop.permute.xlu1 %4600  ;;  %v2117_v25 = vsel %vm1376_vm7, %v4697_v18, 0.0 }
 0x992   : > { %v4603_v26 = vunpack.i.h.bf16 %v4601_v24  ;;  %v4602_v28 = vunpack.i.l.bf16 %v4601_v24  ;;  %2118 = vadd.xlane.f32.xlu1 %v2117_v25  ;;  %4392 = vmatprep.subr.bf16.mxu0 %v4391_v19  ;;  %4704 = vpow2.f32 %v2113_v15 }
 0x993   : > { %v4699_v29 = vpop.eup %4698  ;;  %v4395_v31 = vpack.c.bf16 %v4598_v22, %v4597_v23  ;;  %4394 = vmatpush3.bf16.msra.mxu0 %v4391_v19 }
 0x994   : > { %v2126_v32 = vsel %vm1376_vm7, %v4699_v29, 0.0  ;;  %v4399_v27 = vpack.c.bf16 %v4603_v26, %v4602_v28 }
 0x995   : > { %2127 = vadd.xlane.f32.xlu0 %v2126_v32  ;;  %4396 = vmatprep.subr.bf16.mxu0 %v4395_v31 }
 0x997   : > { %v4701_v33 = vpop.eup %4700  ;;  %4398 = vmatpush3.bf16.msra.mxu0 %v4395_v31 }
 0x998   : > { %4400 = vmatprep.subr.bf16.mxu0 %v4399_v27  ;;  %v2123_v30 = vsel %vm1376_vm7, %v4701_v33, 0.0 }
 0x999   : > { %2124 = vadd.xlane.f32.xlu1 %v2123_v30 }
 0x99b   : > { %v4703_v42 = vpop.eup %4702  ;;  %4402 = vmatpush3.bf16.msra.mxu0 %v4399_v27 }
 0x99c   : > { %v2132_v44 = vsel %vm1376_vm7, %v4703_v42, 0.0  ;;  %v4705_v43 = vpop.eup %4704 }
 0x99d   : > { %2133 = vadd.xlane.f32.xlu0 %v2132_v44  ;;  %v2129_v35 = vsel %vm1376_vm7, %v4705_v43, 0.0  ;;  %v4766_v44 = vld [vmem:[%s5813_s6 + $0x8] sm:$0xff] }
 0x9a1   : > { %2130 = vadd.xlane.f32.xlu0 %v2129_v35 }
 0x9aa   : > { %4610 = vrot.lane.b32.xlu1 %v5128_v9, %s4820_s0 }
 0x9ae   : > { %4615 = vrot.lane.b32.xlu1 %v5137_v12, %s4820_s0 }
 0x9b2   : > { %2278 = vrot.lane.b32.xlu1 %v5113_v5, %s4821_s5 }
 0x9b6   : > { %2280 = vrot.lane.b32.xlu1 %v5111_v4, %s4821_s5 }
 0x9b7   : > { %4605 = vrot.lane.b32.xlu0 %v5119_v6, %s4820_s0 }
 0x9ba   : > { %2282 = vrot.lane.b32.xlu1 %v5124_v8, %s4821_s5 }
 0x9bb   : > { %2284 = vrot.lane.b32.xlu0 %v5122_v7, %s4821_s5 }
 0x9be   : > { %2286 = vrot.lane.b32.xlu1 %v5133_v11, %s4821_s5 }
 0x9bf   : > { %2288 = vrot.lane.b32.xlu0 %v5131_v10, %s4821_s5  ;;  %s5815_s5 = scalar_lea.vmem %s5771_s12, %s4957_s29 }
 0xa1e   : > { %v2122_v41 = vpop.xlane.xlu0 %2121 }
 0xa1f   : > { %4706 = vrcp.f32 %v2122_v41  ;;  %v2119_v48 = vpop.xlane.xlu1 %2118  ;;  %v4767_v41 = vld [vmem:[%s5813_s6] sm:$0xff] }
 0xa20   : > { %4708 = vrcp.f32 %v2119_v48 }
 0xa22   : > { %v2128_v45 = vpop.xlane.xlu0 %2127 }
 0xa23   : > { %4710 = vrcp.f32 %v2128_v45 }
 0xa26   : > { %v2125_v46 = vpop.xlane.xlu1 %2124 }
 0xa27   : > { %4712 = vrcp.f32 %v2125_v46 }
 0xa29   : > { %v4707_v5 = vpop.eup %4706 }
 0xa2a   : > { %v4709_v4 = vpop.eup %4708  ;;  %v2134_v47 = vpop.xlane.xlu0 %2133  ;;  %v2142_v49 = vmul.f32 %v4707_v5, %v4695_v14 }
 0xa2b   : > { %v2141_v50 = vmul.f32 %v4709_v4, %v4697_v18  ;;  %4714 = vrcp.f32 %v2134_v47  ;;  %v4611_v8 = vpop.permute.xlu1 %4610 }
 0xa2c   : > { %v4613_v51 = vunpack.i.h.bf16 %v4611_v8  ;;  %v4612_v54 = vunpack.i.l.bf16 %v4611_v8 }
 0xa2d   : > { %4165 = vmatprep.mubr.msk.f32.mxu0 %vm1376_vm7, %v2141_v50  ;;  %v4711_v10 = vpop.eup %4710 }
 0xa2e   : > { %v2131_v7 = vpop.xlane.xlu0 %2130  ;;  %4166 = vmatmul.mubr.msk.f32.vlgmr.msra.gmra.mrb[18].mxu0 %vm1376_vm7, %v2142_v49  ;;  %v2144_v58 = vmul.f32 %v4711_v10, %v4699_v29  ;;  %v4409_v60 = vpack.c.bf16 %v4613_v51, %v4612_v54  ;;  %v4768_v49 = vld [vmem:[%s5813_s6 + $0x10] sm:$0xff]  ;;  %v4770_v54 = vld [vmem:[%s5813_s6 + $0x20] sm:$0xff] }
 0xa2f   : > { %4716 = vrcp.f32 %v2131_v7  ;;  %v4616_v61 = vpop.permute.xlu1 %4615 }
 0xa30   : > { %v4618_v15 = vunpack.i.h.bf16 %v4616_v61  ;;  %v4617_v17 = vunpack.i.l.bf16 %v4616_v61 }
 0xa31   : > { %v4713_v11 = vpop.eup %4712 }
 0xa32   : > { %v4606_v52 = vpop.permute.xlu0 %4605  ;;  %v2143_v53 = vmul.f32 %v4713_v11, %v4701_v33  ;;  %v4415_v20 = vpack.c.bf16 %v4618_v15, %v4617_v17 }
 0xa33   : > { %v4608_v55 = vunpack.i.h.bf16 %v4606_v52  ;;  %v4607_v56 = vunpack.i.l.bf16 %v4606_v52  ;;  %v2279_v19 = vpop.permute.xlu1 %2278  ;;  %v4769_v52 = vld [vmem:[%s5813_s6 + $0x18] sm:$0xff] }
 0xa34   : > { %4168 = vmatprep.mubr.msk.f32.mxu0 %vm1376_vm7, %v2143_v53 }
 0xa35   : > { %v4403_v59 = vpack.c.bf16 %v4608_v55, %v4607_v56  ;;  %4169 = vmatmul.mubr.msk.f32.gmra.mrb[20].mxu0 %vm1376_vm7, %v2144_v58  ;;  %v4715_v62 = vpop.eup %4714 }
 0xa36   : > { %v2146_v18 = vmul.f32 %v4715_v62, %v4703_v42  ;;  %v2285_v23 = vpop.permute.xlu0 %2284 }
 0xa37   : > { %4405 = vmatprep.subr.msk.bf16.mxu0 %vm5142_vm6, %v4403_v59  ;;  %v2281_v21 = vpop.permute.xlu1 %2280 }
 0xa38   : > { %4408 = vmatpush3.bf16.xpose.msk.msra.mxu0 %vm5142_vm6, %v4403_v59  ;;  %v4771_v59 = vld [vmem:[%s5813_s6 + $0x28] sm:$0xff] }
 0xa39   : > { %v4717_v13 = vpop.eup %4716  ;;  %4411 = vmatprep.subr.msk.bf16.mxu0 %vm5142_vm6, %v4409_v60 }
 0xa3a   : > { %v2145_v14 = vmul.f32 %v4717_v13, %v4705_v43  ;;  %v2289_v25 = vpop.permute.xlu0 %2288 }
 0xa3b   : > { %v2283_v22 = vpop.permute.xlu1 %2282 }
 0xa3c   : > { %4171 = vmatprep.mubr.msk.f32.mxu0 %vm1376_vm7, %v2145_v14 }
 0xa3d   : > { %4172 = vmatmul.mubr.msk.f32.gmra.mrb[22].mxu0 %vm1376_vm7, %v2146_v18 }
 0xa3e   : > { %4186 = vmatprep.mubr.msk.f32.mxu0 %vm1244_vm5, %v2279_v19 }
 0xa3f   : > { %v2287_v24 = vpop.permute.xlu1 %2286 }
 0xa40   : > { %4414 = vmatpush3.bf16.xpose.msk.msra.mxu0 %vm5142_vm6, %v4409_v60 }
 0xa41   : > { %4417 = vmatprep.subr.msk.bf16.mxu0 %vm5142_vm6, %v4415_v20 }
 0xa48   : > { %4420 = vmatpush3.bf16.xpose.msk.msra.mxu0 %vm5142_vm6, %v4415_v20 }
 0xa4f   : > { %4187 = vmatmul.mubr.msk.f32.vlgmr.msra.gmra.mrb[24].mxu0 %vm1244_vm5, %v2281_v21 }
 0xa50   : > { %4189 = vmatprep.mubr.msk.f32.mxu0 %vm1244_vm5, %v2283_v22 }
 0xa53   : > { %4190 = vmatmul.mubr.msk.f32.gmra.mrb[26].mxu0 %vm1244_vm5, %v2285_v23 }
 0xa54   : > { %4192 = vmatprep.mubr.msk.f32.mxu0 %vm1244_vm5, %v2287_v24 }
 0xa57   : > { %4193 = vmatmul.mubr.msk.f32.gmra.mrb[28].mxu0 %vm1244_vm5, %v2289_v25 }
 0xb01   : > { %v5384_v26 = vpop.f32.mrb[18].mxu0 }
 0xb02   : > { %v5386_v28 = vpop.f32.mrb[19].mxu0 }
 0xb08   : > { %v5388_v16 = vpop.f32.mrb[20].mxu0 }
 0xb09   : > { %v5390_v29 = vpop.f32.mrb[21].mxu0 }
 0xb10   : > { %v5392_v31 = vpop.f32.mrb[22].mxu0 }
 0xb11   : > { %v5394_v32 = vpop.f32.mrb[23].mxu0 }
 0xb22   : > { %v4188_v27 = vpop.f32.mrb[24].mxu0 }
 0xb23   : > { %v2422_v33 = vmul.f32 0.35355338, %v4188_v27  ;;  %v2392_v30 = vpop.f32.mrb[25].mxu0 }
 0xb24   : > { %v2421_v42 = vmul.f32 0.35355338, %v2392_v30 }
 0xb25   : > { %v2428_v43 = vadd.f32 %v4766_v44, %v2422_v33 }
 0xb26   : > { %v4191_v35 = vpop.f32.mrb[26].mxu0  ;;  %v2427_v48 = vadd.f32 %v4767_v41, %v2421_v42 }
 0xb27   : > { %v2402_v45 = vpop.f32.mrb[27].mxu0  ;;  %v2436_v46 = vsel %vm1376_vm7, %v2428_v43, -inf  ;;  %v2424_v5 = vmul.f32 0.35355338, %v4191_v35 }
 0xb28   : > { %v2423_v4 = vmul.f32 0.35355338, %v2402_v45  ;;  %2437 = vmax.xlane.f32.xlu0 %v2436_v46  ;;  %v2433_v47 = vsel %vm1376_vm7, %v2427_v48, -inf }
 0xb29   : > { %2434 = vmax.xlane.f32.xlu1 %v2433_v47  ;;  %v2430_v53 = vadd.f32 %v4769_v52, %v2424_v5 }
 0xb2a   : > { %v4194_v50 = vpop.f32.mrb[28].mxu0  ;;  %v2429_v7 = vadd.f32 %v4768_v49, %v2423_v4 }
 0xb2b   : > { %v2412_v8 = vpop.f32.mrb[29].mxu0  ;;  %v2426_v10 = vmul.f32 0.35355338, %v4194_v50  ;;  %v2442_v56 = vsel %vm1376_vm7, %v2430_v53, -inf }
 0xb2c   : > { %v2425_v11 = vmul.f32 0.35355338, %v2412_v8  ;;  %v2439_v51 = vsel %vm1376_vm7, %v2429_v7, -inf }
 0xb2d   : > { %2440 = vmax.xlane.f32.xlu0 %v2439_v51  ;;  %v2432_v60 = vadd.f32 %v4771_v59, %v2426_v10 }
 0xb2e   : > { %v2431_v55 = vadd.f32 %v4770_v54, %v2425_v11 }
 0xb2f   : > { %v2448_v61 = vsel %vm1376_vm7, %v2432_v60, -inf }
 0xb30   : > { %v2445_v58 = vsel %vm1376_vm7, %v2431_v55, -inf }
 0xb31   : > { %2443 = vmax.xlane.f32.xlu0 %v2442_v56  ;;  %2446 = vmax.xlane.f32.xlu1 %v2445_v58 }
 0xb35   : > { %2449 = vmax.xlane.f32.xlu0 %v2448_v61 }
 0xb42   : > { %4620 = vrot.lane.b32.xlu1 %v5119_v6, %s4822_s18 }
 0xbb5   : > { %v2438_v62 = vpop.xlane.xlu0 %2437 }
 0xbb6   : > { %v2452_v13 = vsub.f32 %v2428_v43, %v2438_v62  ;;  %v2435_v14 = vpop.xlane.xlu1 %2434 }
 0xbb7   : > { %v2451_v15 = vsub.f32 %v2427_v48, %v2435_v14  ;;  %v2722_v14 = vld [vmem:[%s4980_s22] sm:$0xff] }
 0xbb8   : > { %v2459_v17 = vmul.f32 1.442695, %v2452_v13 }
 0xbb9   : > { %v2457_v18 = vmul.f32 1.442695, %v2451_v15  ;;  %v2723_v15 = vld [vmem:[%s4980_s22 + $0x8] sm:$0xff] }
 0xbba   : > { %4718 = vpow2.f32 %v2459_v17  ;;  %v2441_v19 = vpop.xlane.xlu0 %2440  ;;  %v2724_v17 = vld [vmem:[%s4980_s22 + $0x10] sm:$0xff] }
 0xbbb   : > { %4720 = vpow2.f32 %v2457_v18  ;;  %v2453_v20 = vsub.f32 %v2429_v7, %v2441_v19  ;;  %v4433_v18 = vpack.c.bf16 %v2723_v15, %v2722_v14  ;;  %v2725_v19 = vld [vmem:[%s4980_s22 + $0x18] sm:$0xff]  ;;  %s5820_s22 = sld [smem:[#allocation18_spill]] (!%p3849_p5) }
 0xbbd   : > { %v2461_v21 = vmul.f32 1.442695, %v2453_v20  ;;  %v4437_v20 = vpack.c.bf16 %v2725_v19, %v2724_v17 }
 0xbbe   : > { %v2444_v22 = vpop.xlane.xlu0 %2443  ;;  %v2447_v23 = vpop.xlane.xlu1 %2446 }
 0xbbf   : > { %4722 = vpow2.f32 %v2461_v21  ;;  %v2454_v24 = vsub.f32 %v2430_v53, %v2444_v22  ;;  %v2455_v25 = vsub.f32 %v2431_v55, %v2447_v23 }
 0xbc1   : > { %v2463_v27 = vmul.f32 1.442695, %v2454_v24  ;;  %v2465_v33 = vmul.f32 1.442695, %v2455_v25 }
 0xbc2   : > { %v2450_v30 = vpop.xlane.xlu0 %2449  ;;  %v4621_v6 = vpop.permute.xlu1 %4620 }
 0xbc3   : > { %4724 = vpow2.f32 %v2463_v27  ;;  %v2456_v42 = vsub.f32 %v2432_v60, %v2450_v30  ;;  %v4623_v44 = vunpack.i.h.bf16 %v4621_v6  ;;  %v4622_v43 = vunpack.i.l.bf16 %v4621_v6 }
 0xbc4   : > { %v5422_v35 = vpop.eup %4718  ;;  %4726 = vpow2.f32 %v2465_v33 }
 0xbc5   : > { %v4721_v41 = vpop.eup %4720  ;;  %v2467_v48 = vmul.f32 1.442695, %v2456_v42  ;;  %v4421_v45 = vpack.c.bf16 %v4623_v44, %v4622_v43  ;;  %v2472_v46 = vsel %vm1376_vm7, %v5422_v35, 0.0 }
 0xbc6   : > { %2473 = vadd.xlane.f32.xlu0 %v2472_v46  ;;  %v2469_v5 = vsel %vm1376_vm7, %v4721_v41, 0.0 }
 0xbc7   : > { %4728 = vpow2.f32 %v2467_v48  ;;  %2470 = vadd.xlane.f32.xlu1 %v2469_v5  ;;  %4422 = vmatprep.subr.bf16.mxu1 %v4421_v45 }
 0xbc8   : > { %4424 = vmatpush3.bf16.msra.mxu1 %v4421_v45 }
 0xbc9   : > { %v4723_v4 = vpop.eup %4722 }
 0xbca   : > { %v2475_v47 = vsel %vm1376_vm7, %v4723_v4, 0.0 }
 0xbcb   : > { %2476 = vadd.xlane.f32.xlu1 %v2475_v47 }
 0xbcd   : > { %v4725_v50 = vpop.eup %4724 }
 0xbce   : > { %v4727_v49 = vpop.eup %4726  ;;  %v2478_v7 = vsel %vm1376_vm7, %v4725_v50, 0.0 }
 0xbcf   : > { %2479 = vadd.xlane.f32.xlu0 %v2478_v7  ;;  %v2481_v8 = vsel %vm1376_vm7, %v4727_v49, 0.0 }
 0xbd0   : > { %2482 = vadd.xlane.f32.xlu1 %v2481_v8 }
 0xbd1   : > { %v4729_v10 = vpop.eup %4728 }
 0xbd2   : > { %v2484_v11 = vsel %vm1376_vm7, %v4729_v10, 0.0 }
 0xbd3   : > { %2485 = vadd.xlane.f32.xlu0 %v2484_v11 }
 0xbe1   : > { %4630 = vrot.lane.b32.xlu1 %v5137_v12, %s4822_s18 }
 0xbe5   : > { %2636 = vrot.lane.b32.xlu1 %v5320_v57, %s4823_s30 }
 0xbe9   : > { %2638 = vrot.lane.b32.xlu1 %v5318_v63, %s4823_s30  ;;  %4625 = vrot.lane.b32.xlu0 %v5128_v9, %s4822_s18 }
 0xbed   : > { %2662 = vrot.lane.b32.xlu1 %v5384_v26, %s4824_s27  ;;  %2660 = vrot.lane.b32.xlu0 %v5386_v28, %s4824_s27 }
 0xbf1   : > { %2642 = vrot.lane.b32.xlu1 %v5322_v0, %s4823_s30  ;;  %2640 = vrot.lane.b32.xlu0 %v5324_v2, %s4823_s30 }
 0xbf5   : > { %2666 = vrot.lane.b32.xlu1 %v5388_v16, %s4824_s27  ;;  %2664 = vrot.lane.b32.xlu0 %v5390_v29, %s4824_s27 }
 0xbf9   : > { %2646 = vrot.lane.b32.xlu1 %v5326_v3, %s4823_s30  ;;  %2644 = vrot.lane.b32.xlu0 %v5328_v1, %s4823_s30  ;;  %s5816_s30 = scalar_lea.vmem %s5776_s17, %s4957_s29  ;;  %s5819_s29 = sld [smem:[#allocation17_spill]] (!%p3849_p5) }
 0xbfd   : > { %2670 = vrot.lane.b32.xlu1 %v5392_v31, %s4824_s27  ;;  %2668 = vrot.lane.b32.xlu0 %v5394_v32, %s4824_s27 }
 0xc53   : > { %v2474_v12 = vpop.xlane.xlu0 %2473 }
 0xc54   : > { %v2471_v9 = vpop.xlane.xlu1 %2470 }
 0xc55   : > { %4730 = vrcp.f32 %v2471_v9 }
 0xc56   : > { %4732 = vrcp.f32 %v2474_v12 }
 0xc58   : > { %v2477_v63 = vpop.xlane.xlu1 %2476 }
 0xc59   : > { %4734 = vrcp.f32 %v2477_v63 }
 0xc5c   : > { %v2480_v57 = vpop.xlane.xlu0 %2479 }
 0xc5d   : > { %v2483_v0 = vpop.xlane.xlu1 %2482  ;;  %4736 = vrcp.f32 %v2480_v57 }
 0xc5e   : > { %4738 = vrcp.f32 %v2483_v0 }
 0xc5f   : > { %v4731_v26 = vpop.eup %4730 }
 0xc60   : > { %v2486_v2 = vpop.xlane.xlu0 %2485  ;;  %v2493_v28 = vmul.f32 %v4731_v26, %v4721_v41  ;;  %v4733_v53 = vpop.eup %4732 }
 0xc61   : > { %v4631_v16 = vpop.permute.xlu1 %4630  ;;  %4740 = vrcp.f32 %v2486_v2  ;;  %v2494_v55 = vmul.f32 %v4733_v53, %v5422_v35 }
 0xc62   : > { %4207 = vmatprep.mubr.msk.f32.mxu1 %vm1376_vm7, %v2493_v28  ;;  %v4633_v1 = vunpack.i.h.bf16 %v4631_v16  ;;  %v4632_v29 = vunpack.i.l.bf16 %v4631_v16 }
 0xc63   : > { %v4735_v54 = vpop.eup %4734 }
 0xc64   : > { %v4626_v3 = vpop.permute.xlu0 %4625  ;;  %v4429_v52 = vpack.c.bf16 %v4633_v1, %v4632_v29  ;;  %v2495_v58 = vmul.f32 %v4735_v54, %v4723_v4 }
 0xc65   : > { %v4628_v31 = vunpack.i.h.bf16 %v4626_v3  ;;  %v4627_v51 = vunpack.i.l.bf16 %v4626_v3  ;;  %v2637_v33 = vpop.permute.xlu1 %2636 }
 0xc66   : > { %v2702_v4 = vsel %vm1244_vm5, %v5254_v36, %v2637_v33 }
 0xc67   : > { %v4425_v32 = vpack.c.bf16 %v4628_v31, %v4627_v51  ;;  %v4737_v56 = vpop.eup %4736 }
 0xc68   : > { %v4739_v59 = vpop.eup %4738  ;;  %v2496_v60 = vmul.f32 %v4737_v56, %v4725_v50  ;;  %v2661_v42 = vpop.permute.xlu0 %2660 }
 0xc69   : > { %4426 = vmatprep.subr.bf16.mxu1 %v4425_v32  ;;  %v2497_v62 = vmul.f32 %v4739_v59, %v4727_v49  ;;  %v2639_v30 = vpop.permute.xlu1 %2638  ;;  %v2709_v50 = vsel %vm2708_vm8, %v2702_v4, %v2661_v42 }
 0xc6a   : > { %4428 = vmatpush3.bf16.msra.mxu1 %v4425_v32  ;;  %v2703_v49 = vsel %vm1244_vm5, %v5252_v34, %v2639_v30 }
 0xc6b   : > { %4430 = vmatprep.subr.bf16.mxu1 %v4429_v52  ;;  %v4741_v61 = vpop.eup %4740 }
 0xc6c   : > { %v2498_v13 = vmul.f32 %v4741_v61, %v4729_v10  ;;  %v2641_v43 = vpop.permute.xlu0 %2640 }
 0xc6d   : > { %v2663_v6 = vpop.permute.xlu1 %2662  ;;  %v2704_v9 = vsel %vm1244_vm5, %v5258_v38, %v2641_v43 }
 0xc6e   : > { %4432 = vmatpush3.bf16.msra.mxu1 %v4429_v52  ;;  %v2710_v8 = vsel %vm2708_vm8, %v2703_v49, %v2663_v6 }
 0xc6f   : > { %4434 = vmatprep.subr.bf16.mxu1 %v4433_v18 }
 0xc70   : > { %v2665_v41 = vpop.permute.xlu0 %2664 }
 0xc71   : > { %4208 = vmatmul.mubr.msk.f32.vlgmr.msra.gmra.mrb[18].mxu1 %vm1376_vm7, %v2494_v55  ;;  %v2643_v44 = vpop.permute.xlu1 %2642  ;;  %v2711_v12 = vsel %vm2708_vm8, %v2704_v9, %v2665_v41 }
 0xc72   : > { %4210 = vmatprep.mubr.msk.f32.mxu1 %vm1376_vm7, %v2495_v58  ;;  %4436 = vmatpush3.bf16.msra.mxu1 %v4433_v18  ;;  %v2705_v34 = vsel %vm1244_vm5, %v5256_v37, %v2643_v44 }
 0xc73   : > { %4438 = vmatprep.subr.bf16.mxu1 %v4437_v20 }
 0xc74   : > { %v2645_v45 = vpop.permute.xlu0 %2644 }
 0xc75   : > { %4211 = vmatmul.mubr.msk.f32.gmra.mrb[20].mxu1 %vm1376_vm7, %v2496_v60  ;;  %v2667_v35 = vpop.permute.xlu1 %2666  ;;  %v2706_v38 = vsel %vm1244_vm5, %v5262_v40, %v2645_v45  ;;  %v3820_v40 = vld [vmem:[%s5814_s21] ss:$0 sm:$0xff] }
 0xc76   : > { %4213 = vmatprep.mubr.msk.f32.mxu1 %vm1376_vm7, %v2497_v62  ;;  %4440 = vmatpush3.bf16.msra.mxu1 %v4437_v20  ;;  %v2712_v57 = vsel %vm2708_vm8, %v2705_v34, %v2667_v35 }
 0xc78   : > { %v2669_v5 = vpop.permute.xlu0 %2668 }
 0xc79   : > { %4214 = vmatmul.mubr.msk.f32.gmra.mrb[22].mxu1 %vm1376_vm7, %v2498_v13  ;;  %v2647_v48 = vpop.permute.xlu1 %2646  ;;  %v2713_v28 = vsel %vm2708_vm8, %v2706_v38, %v2669_v5 }
 0xc7a   : > { %v2707_v37 = vsel %vm1244_vm5, %v5260_v39, %v2647_v48 }
 0xc7d   : > { %v2671_v46 = vpop.permute.xlu1 %2670 }
 0xc7e   : > { %v2714_v3 = vsel %vm2708_vm8, %v2707_v37, %v2671_v46 }
 0xd44   : > { %v4209_v21 = vpop.f32.mrb[18].mxu1 }
 0xd45   : > { %2686 = vrot.lane.b32.xlu1 %v4209_v21, %s4825_s3  ;;  %v2601_v22 = vpop.f32.mrb[19].mxu1 }
 0xd46   : > { %2684 = vrot.lane.b32.xlu0 %v2601_v22, %s4825_s3 }
 0xd48   : > { %v4212_v23 = vpop.f32.mrb[20].mxu1 }
 0xd49   : > { %2690 = vrot.lane.b32.xlu1 %v4212_v23, %s4825_s3  ;;  %v2611_v24 = vpop.f32.mrb[21].mxu1 }
 0xd4a   : > { %2688 = vrot.lane.b32.xlu0 %v2611_v24, %s4825_s3 }
 0xd4c   : > { %v4215_v25 = vpop.f32.mrb[22].mxu1 }
 0xd4d   : > { %2694 = vrot.lane.b32.xlu1 %v4215_v25, %s4825_s3  ;;  %v2621_v27 = vpop.f32.mrb[23].mxu1 }
 0xd4e   : > { %2692 = vrot.lane.b32.xlu0 %v2621_v27, %s4825_s3  ;;  %s5817_s3 = sld [smem:[#allocation13_spill]] (!%p3849_p5) }
 0xdb7   : > { %v2687_v47 = vpop.permute.xlu1 %2686 }
 0xdb8   : > { %v2685_v7 = vpop.permute.xlu0 %2684  ;;  %v2717_v11 = vsel %vm2715_vm9, %v2710_v8, %v2687_v47 }
 0xdb9   : > { %v2716_v10 = vsel %vm2715_vm9, %v2709_v50, %v2685_v7 }
 0xdba   : > { %4224 = vmatprep.mubr.msk.f32.mxu1 %vm999_vm4, %v2716_v10 }
 0xdbb   : > { %4225 = vmatmul.mubr.msk.f32.vlgmr.msra.gmra.mrb[24].mxu1 %vm999_vm4, %v2717_v11  ;;  %v2691_v36 = vpop.permute.xlu1 %2690 }
 0xdbc   : > { %v2689_v63 = vpop.permute.xlu0 %2688  ;;  %v2719_v26 = vsel %vm2715_vm9, %v2712_v57, %v2691_v36  ;;  %v2950_v36 = vld [vmem:[%s4993_s26] sm:$0xff]  ;;  %v2953_v57 = vld [vmem:[%s4993_s26 + $0x18] sm:$0xff] }
 0xdbd   : > { %v2718_v0 = vsel %vm2715_vm9, %v2711_v12, %v2689_v63  ;;  %v2951_v12 = vld [vmem:[%s4993_s26 + $0x8] sm:$0xff]  ;;  %v2952_v63 = vld [vmem:[%s4993_s26 + $0x10] sm:$0xff] }
 0xdbe   : > { %4227 = vmatprep.mubr.msk.f32.mxu1 %vm999_vm4, %v2718_v0  ;;  %v4441_v34 = vpack.c.bf16 %v2951_v12, %v2950_v36  ;;  %v4445_v0 = vpack.c.bf16 %v2953_v57, %v2952_v63 }
 0xdbf   : > { %4228 = vmatmul.mubr.msk.f32.gmra.mrb[26].mxu1 %vm999_vm4, %v2719_v26  ;;  %v2695_v2 = vpop.permute.xlu1 %2694 }
 0xdc0   : > { %v2693_v16 = vpop.permute.xlu0 %2692  ;;  %v2721_v29 = vsel %vm2715_vm9, %v2714_v3, %v2695_v2  ;;  %4442 = vmatprep.subr.bf16.mxu0 %v4441_v34 }
 0xdc1   : > { %v2720_v1 = vsel %vm2715_vm9, %v2713_v28, %v2693_v16  ;;  %4444 = vmatpush3.bf16.msra.mxu0 %v4441_v34 }
 0xdc2   : > { %4230 = vmatprep.mubr.msk.f32.mxu1 %vm999_vm4, %v2720_v1  ;;  %4446 = vmatprep.subr.bf16.mxu0 %v4445_v0 }
 0xdc3   : > { %4231 = vmatmul.mubr.msk.f32.gmra.mrb[28].mxu1 %vm999_vm4, %v2721_v29 }
 0xdc5   : > { %4448 = vmatpush3.bf16.msra.mxu0 %v4445_v0 }
 0xe8e   : > { %v4226_v31 = vpop.f32.mrb[24].mxu1 }
 0xe8f   : > { %v2823_v51 = vadd.f32 %v4226_v31, %v3820_v40  ;;  %v2817_v32 = vpop.f32.mrb[25].mxu1 }
 0xe90   : > { %v2818_v39 = vadd.f32 %v3820_v40, %v2817_v32 }
 0xe91   : > { %v2851_v52 = vsel %vm999_vm4, %v2823_v51, 0.0 }
 0xe92   : > { %2852 = vadd.xlane.f32.xlu1 %v2851_v52  ;;  %v4229_v53 = vpop.f32.mrb[26].mxu1  ;;  %v2848_v54 = vsel %vm999_vm4, %v2818_v39, 0.0 }
 0xe93   : > { %v2833_v55 = vadd.f32 %v4229_v53, %v3820_v40  ;;  %v2827_v56 = vpop.f32.mrb[27].mxu1  ;;  %2849 = vadd.xlane.f32.xlu0 %v2848_v54 }
 0xe94   : > { %v2828_v59 = vadd.f32 %v3820_v40, %v2827_v56  ;;  %v3827_v56 = vld [vmem:[%s5815_s5] ss:$0 sm:$0xff] }
 0xe95   : > { %v2857_v58 = vsel %vm999_vm4, %v2833_v55, 0.0 }
 0xe96   : > { %v4232_v60 = vpop.f32.mrb[28].mxu1  ;;  %v2854_v15 = vsel %vm999_vm4, %v2828_v59, 0.0 }
 0xe97   : > { %v2843_v61 = vadd.f32 %v4232_v60, %v3820_v40  ;;  %v2837_v62 = vpop.f32.mrb[29].mxu1  ;;  %2858 = vadd.xlane.f32.xlu0 %v2857_v58 }
 0xe98   : > { %v2838_v14 = vadd.f32 %v3820_v40, %v2837_v62  ;;  %v3828_v62 = vld [vmem:[%s811_s19] ss:$0 sm:$0xff] }
 0xe99   : > { %v2863_v13 = vsel %vm999_vm4, %v2843_v61, 0.0 }
 0xe9a   : > { %2864 = vadd.xlane.f32.xlu1 %v2863_v13  ;;  %v2860_v17 = vsel %vm999_vm4, %v2838_v14, 0.0 }
 0xe9b   : > { %2855 = vadd.xlane.f32.xlu0 %v2854_v15 }
 0xe9f   : > { %2861 = vadd.xlane.f32.xlu0 %v2860_v17 }
 0xf1f   : > { %v2853_v18 = vpop.xlane.xlu1 %2852 }
 0xf20   : > { %v2867_v19 = vmul.f32 0.03125, %v2853_v18  ;;  %v2850_v20 = vpop.xlane.xlu0 %2849 }
 0xf21   : > { %v2866_v21 = vmul.f32 0.03125, %v2850_v20 }
 0xf22   : > { %v5499_v22 = vsub.f32 %v2823_v51, %v2867_v19 }
 0xf23   : > { %v5501_v23 = vsub.f32 %v2818_v39, %v2866_v21 }
 0xf24   : > { %v2859_v24 = vpop.xlane.xlu0 %2858  ;;  %v2879_v25 = vmul.f32 %v5499_v22, %v5499_v22 }
 0xf25   : > { %v2869_v27 = vmul.f32 0.03125, %v2859_v24  ;;  %v2878_v33 = vmul.f32 %v5501_v23, %v5501_v23 }
 0xf26   : > { %v2887_v30 = vsel %vm999_vm4, %v2879_v25, 0.0 }
 0xf27   : > { %v5508_v6 = vsub.f32 %v2833_v55, %v2869_v27  ;;  %2888 = vadd.xlane.f32.xlu1 %v2887_v30  ;;  %v2865_v42 = vpop.xlane.xlu1 %2864  ;;  %v2884_v44 = vsel %vm999_vm4, %v2878_v33, 0.0 }
 0xf28   : > { %v2871_v43 = vmul.f32 0.03125, %v2865_v42  ;;  %2885 = vadd.xlane.f32.xlu0 %v2884_v44  ;;  %v2856_v35 = vpop.xlane.xlu0 %2855 }
 0xf29   : > { %v2868_v41 = vmul.f32 0.03125, %v2856_v35  ;;  %v2881_v48 = vmul.f32 %v5508_v6, %v5508_v6 }
 0xf2a   : > { %v5513_v45 = vsub.f32 %v2843_v61, %v2871_v43 }
 0xf2b   : > { %v5515_v46 = vsub.f32 %v2828_v59, %v2868_v41  ;;  %v2893_v5 = vsel %vm999_vm4, %v2881_v48, 0.0  ;;  %v3248_v41 = vld [vmem:[%s5007_s23] sm:$0xff]  ;;  %v3249_v48 = vld [vmem:[%s5007_s23 + $0x8] sm:$0xff] }
 0xf2c   : > { %2894 = vadd.xlane.f32.xlu1 %v2893_v5  ;;  %v2862_v4 = vpop.xlane.xlu0 %2861  ;;  %v2883_v47 = vmul.f32 %v5513_v45, %v5513_v45  ;;  %v3251_v5 = vld [vmem:[%s5007_s23 + $0x18] sm:$0xff] }
 0xf2d   : > { %v2870_v50 = vmul.f32 0.03125, %v2862_v4  ;;  %v2880_v49 = vmul.f32 %v5515_v46, %v5515_v46 }
 0xf2e   : > { %v2899_v7 = vsel %vm999_vm4, %v2883_v47, 0.0  ;;  %v3252_v47 = vld [vmem:[%s5007_s23 + $0x20] sm:$0xff] }
 0xf2f   : > { %v2876_v8 = vsub.f32 %v2838_v14, %v2870_v50  ;;  %v2890_v10 = vsel %vm999_vm4, %v2880_v49, 0.0  ;;  %v3253_v50 = vld [vmem:[%s5007_s23 + $0x28] sm:$0xff] }
 0xf30   : > { %2900 = vadd.xlane.f32.xlu1 %v2899_v7  ;;  %2891 = vadd.xlane.f32.xlu0 %v2890_v10  ;;  %v4457_v49 = vpack.c.bf16 %v3253_v50, %v3252_v47  ;;  %v3254_v7 = vld [vmem:[%s5007_s23 + $0x30] sm:$0xff] }
 0xf31   : > { %v2882_v11 = vmul.f32 %v2876_v8, %v2876_v8 }
 0xf33   : > { %v2896_v9 = vsel %vm999_vm4, %v2882_v11, 0.0  ;;  %v3829_v11 = vld [vmem:[%s819_s9] ss:$0 sm:$0xff]  ;;  %s5818_s9 = sld [smem:[#allocation16_spill]] (!%p3849_p5) }
 0xf34   : > { %2897 = vadd.xlane.f32.xlu0 %v2896_v9 }
 0xfb4   : > { %v2889_v26 = vpop.xlane.xlu1 %2888 }
 0xfb5   : > { %v2903_v38 = vmul.f32 0.03125, %v2889_v26  ;;  %v2886_v2 = vpop.xlane.xlu0 %2885 }
 0xfb6   : > { %v2902_v28 = vmul.f32 0.03125, %v2886_v2 }
 0xfb7   : > { %v2909_v37 = vadd.f32 1e-05, %v2903_v38 }
 0xfb8   : > { %v2908_v16 = vadd.f32 1e-05, %v2902_v28 }
 0xfb9   : > { %4742 = vrsqrt.f32 %v2909_v37  ;;  %v2895_v3 = vpop.xlane.xlu1 %2894 }
 0xfba   : > { %4744 = vrsqrt.f32 %v2908_v16  ;;  %v2905_v1 = vmul.f32 0.03125, %v2895_v3 }
 0xfbc   : > { %v2911_v29 = vadd.f32 1e-05, %v2905_v1 }
 0xfbd   : > { %v2901_v40 = vpop.xlane.xlu1 %2900  ;;  %v2892_v31 = vpop.xlane.xlu0 %2891 }
 0xfbe   : > { %4746 = vrsqrt.f32 %v2911_v29  ;;  %v2907_v51 = vmul.f32 0.03125, %v2901_v40  ;;  %v2904_v32 = vmul.f32 0.03125, %v2892_v31 }
 0xfc0   : > { %v2913_v39 = vadd.f32 1e-05, %v2907_v51  ;;  %v2910_v52 = vadd.f32 1e-05, %v2904_v32 }
 0xfc1   : > { %v2898_v53 = vpop.xlane.xlu0 %2897 }
 0xfc2   : > { %4748 = vrsqrt.f32 %v2913_v39  ;;  %v2906_v54 = vmul.f32 0.03125, %v2898_v53 }
 0xfc3   : > { %v4743_v55 = vpop.eup %4742  ;;  %4750 = vrsqrt.f32 %v2910_v52 }
 0xfc4   : > { %v4745_v58 = vpop.eup %4744  ;;  %v2921_v59 = vmul.f32 %v4743_v55, %v5499_v22  ;;  %v2912_v60 = vadd.f32 1e-05, %v2906_v54 }
 0xfc5   : > { %v2920_v61 = vmul.f32 %v4745_v58, %v5501_v23 }
 0xfc6   : > { %v2933_v13 = vmul.f32 %v3827_v56, %v2921_v59  ;;  %4752 = vrsqrt.f32 %v2912_v60 }
 0xfc7   : > { %v2932_v14 = vmul.f32 %v3827_v56, %v2920_v61 }
 0xfc8   : > { %v4747_v15 = vpop.eup %4746  ;;  %v2945_v18 = vadd.f32 %v3828_v62, %v2933_v13 }
 0xfc9   : > { %v2944_v17 = vadd.f32 %v3828_v62, %v2932_v14  ;;  %v2923_v19 = vmul.f32 %v4747_v15, %v5508_v6 }
 0xfcb   : > { %4241 = vmatprep.mubr.msk.f32.mxu0 %vm999_vm4, %v2944_v17  ;;  %v2935_v23 = vmul.f32 %v3827_v56, %v2923_v19 }
 0xfcc   : > { %v4749_v20 = vpop.eup %4748  ;;  %4242 = vmatmul.mubr.msk.f32.vlgmr.msra.gmra.mrb[30].mxu0 %vm999_vm4, %v2945_v18 }
 0xfcd   : > { %v4751_v21 = vpop.eup %4750  ;;  %v2925_v24 = vmul.f32 %v4749_v20, %v5513_v45  ;;  %v2947_v42 = vadd.f32 %v3828_v62, %v2935_v23  ;;  %v4449_v45 = vpack.c.bf16 %v3249_v48, %v3248_v41 }
 0xfce   : > { %v2922_v22 = vmul.f32 %v4751_v21, %v5515_v46  ;;  %v3250_v46 = vld [vmem:[%s5007_s23 + $0x10] sm:$0xff] }
 0xfcf   : > { %v2937_v6 = vmul.f32 %v3827_v56, %v2925_v24  ;;  %4450 = vmatprep.subr.bf16.mxu1 %v4449_v45  ;;  %v4453_v4 = vpack.c.bf16 %v3251_v5, %v3250_v46 }
 0xfd0   : > { %v4753_v25 = vpop.eup %4752  ;;  %v2934_v27 = vmul.f32 %v3827_v56, %v2922_v22  ;;  %4452 = vmatpush3.bf16.msra.mxu1 %v4449_v45 }
 0xfd1   : > { %v2924_v33 = vmul.f32 %v4753_v25, %v2876_v8  ;;  %v2949_v35 = vadd.f32 %v3828_v62, %v2937_v6  ;;  %4454 = vmatprep.subr.bf16.mxu1 %v4453_v4  ;;  %v3255_v8 = vld [vmem:[%s5007_s23 + $0x38] sm:$0xff] }
 0xfd2   : > { %v2946_v30 = vadd.f32 %v3828_v62, %v2934_v27  ;;  %v4461_v10 = vpack.c.bf16 %v3255_v8, %v3254_v7 }
 0xfd3   : > { %v2936_v44 = vmul.f32 %v3827_v56, %v2924_v33 }
 0xfd4   : > { %4244 = vmatprep.mubr.msk.f32.mxu0 %vm999_vm4, %v2946_v30  ;;  %4456 = vmatpush3.bf16.msra.mxu1 %v4453_v4 }
 0xfd5   : > { %4245 = vmatmul.mubr.msk.f32.gmra.mrb[32].mxu0 %vm999_vm4, %v2947_v42  ;;  %v2948_v43 = vadd.f32 %v3828_v62, %v2936_v44  ;;  %4458 = vmatprep.subr.bf16.mxu1 %v4457_v49 }
 0xfd7   : > { %4247 = vmatprep.mubr.msk.f32.mxu0 %vm999_vm4, %v2948_v43 }
 0xfd8   : > { %4460 = vmatpush3.bf16.msra.mxu1 %v4457_v49 }
 0xfd9   : > { %4248 = vmatmul.mubr.msk.f32.gmra.mrb[34].mxu0 %vm999_vm4, %v2949_v35  ;;  %4462 = vmatprep.subr.bf16.mxu1 %v4461_v10 }
 0xfdc   : > { %4464 = vmatpush3.bf16.msra.mxu1 %v4461_v10 }
0x109f   : > { %v4243_v9 = vpop.f32.mrb[30].mxu0 }
0x10a0   : > { %v5563_v36 = vadd.f32 %v4243_v9, %v3829_v11  ;;  %v3045_v12 = vpop.f32.mrb[31].mxu0 }
0x10a1   : > { %v5565_v34 = vadd.f32 %v3829_v11, %v3045_v12 }
0x10a2   : > { %v3075_v63 = vmul.f32 0.70710677, %v5563_v36 }
0x10a3   : > { %v3074_v57 = vmul.f32 0.70710677, %v5565_v34 }
0x10a4   : > { %v5569_v0 = vclamps-f32 %v3075_v63, 4.0 }
0x10a5   : > { %v5571_v26 = vclamps-f32 %v3074_v57, 4.0 }
0x10a6   : > { %v5575_v38 = vmul.f32 %v5569_v0, %v5569_v0 }
0x10a7   : > { %v5579_v2 = vmul.f32 %v5571_v26, %v5571_v26 }
0x10a8   : > { %v3099_v28 = vmul.f32 -1.3630712e-10, %v5575_v38  ;;  %v3177_v37 = vmul.f32 -1.45660715e-05, %v5575_v38  ;;  %v4246_v16 = vpop.f32.mrb[32].mxu0 }
0x10a9   : > { %v3098_v3 = vmul.f32 -1.3630712e-10, %v5579_v2  ;;  %v3176_v1 = vmul.f32 -1.45660715e-05, %v5579_v2  ;;  %v5585_v29 = vadd.f32 %v4246_v16, %v3829_v11  ;;  %v3055_v40 = vpop.f32.mrb[33].mxu0 }
0x10aa   : > { %v3105_v31 = vadd.f32 1.3853407e-08, %v3099_v28  ;;  %v3183_v51 = vadd.f32 -0.00021337405, %v3177_v37  ;;  %v5587_v32 = vadd.f32 %v3829_v11, %v3055_v40 }
0x10ab   : > { %v3104_v39 = vadd.f32 1.3853407e-08, %v3098_v3  ;;  %v3182_v52 = vadd.f32 -0.00021337405, %v3176_v1  ;;  %v3077_v53 = vmul.f32 0.70710677, %v5585_v29 }
0x10ac   : > { %v3111_v54 = vmul.f32 %v3105_v31, %v5575_v38  ;;  %v3189_v55 = vmul.f32 %v3183_v51, %v5575_v38  ;;  %v3076_v56 = vmul.f32 0.70710677, %v5587_v32  ;;  %v4249_v58 = vpop.f32.mrb[34].mxu0 }
0x10ad   : > { %v3110_v59 = vmul.f32 %v3104_v39, %v5579_v2  ;;  %v3188_v60 = vmul.f32 %v3182_v52, %v5579_v2  ;;  %v5595_v61 = vclamps-f32 %v3077_v53, 4.0  ;;  %v5597_v62 = vadd.f32 %v4249_v58, %v3829_v11  ;;  %v3065_v13 = vpop.f32.mrb[35].mxu0 }
0x10ae   : > { %v3117_v14 = vadd.f32 -1.050512e-06, %v3111_v54  ;;  %v3195_v15 = vadd.f32 -0.001682827, %v3189_v55  ;;  %v5599_v17 = vclamps-f32 %v3076_v56, 4.0  ;;  %v5601_v18 = vadd.f32 %v3829_v11, %v3065_v13 }
0x10af   : > { %v3116_v19 = vadd.f32 -1.050512e-06, %v3110_v59  ;;  %v3194_v20 = vadd.f32 -0.001682827, %v3188_v60  ;;  %v5605_v21 = vmul.f32 %v5595_v61, %v5595_v61  ;;  %v3079_v22 = vmul.f32 0.70710677, %v5597_v62 }
0x10b0   : > { %v3123_v23 = vmul.f32 %v3117_v14, %v5575_v38  ;;  %v3201_v24 = vmul.f32 %v3195_v15, %v5575_v38  ;;  %v5612_v25 = vmul.f32 %v5599_v17, %v5599_v17  ;;  %v3078_v27 = vmul.f32 0.70710677, %v5601_v18 }
0x10b1   : > { %v3122_v33 = vmul.f32 %v3116_v19, %v5579_v2  ;;  %v3200_v30 = vmul.f32 %v3194_v20, %v5579_v2  ;;  %v3101_v42 = vmul.f32 -1.3630712e-10, %v5605_v21  ;;  %v3179_v44 = vmul.f32 -1.45660715e-05, %v5605_v21 }
0x10b2   : > { %v3129_v6 = vadd.f32 -2.8462531e-05, %v3123_v23  ;;  %v3207_v43 = vadd.f32 -0.0073733293, %v3201_v24  ;;  %v3100_v35 = vmul.f32 -1.3630712e-10, %v5612_v25 }
0x10b3   : > { %v3128_v41 = vadd.f32 -2.8462531e-05, %v3122_v33  ;;  %v3206_v48 = vadd.f32 -0.0073733293, %v3200_v30  ;;  %v3107_v45 = vadd.f32 1.3853407e-08, %v3101_v42 }
0x10b4   : > { %v3135_v46 = vmul.f32 %v3129_v6, %v5575_v38  ;;  %v3213_v5 = vmul.f32 %v3207_v43, %v5575_v38  ;;  %v3185_v4 = vadd.f32 -0.00021337405, %v3179_v44  ;;  %v3106_v47 = vadd.f32 1.3853407e-08, %v3100_v35 }
0x10b5   : > { %v3134_v50 = vmul.f32 %v3128_v41, %v5579_v2  ;;  %v3212_v49 = vmul.f32 %v3206_v48, %v5579_v2  ;;  %v3113_v7 = vmul.f32 %v3107_v45, %v5605_v21  ;;  %v3178_v8 = vmul.f32 -1.45660715e-05, %v5612_v25 }
0x10b6   : > { %v3141_v10 = vadd.f32 -0.00036749532, %v3135_v46  ;;  %v3219_v11 = vadd.f32 -0.014264739, %v3213_v5  ;;  %v3191_v9 = vmul.f32 %v3185_v4, %v5605_v21  ;;  %v3112_v12 = vmul.f32 %v3106_v47, %v5612_v25 }
0x10b7   : > { %v3140_v63 = vadd.f32 -0.00036749532, %v3134_v50  ;;  %v3218_v57 = vadd.f32 -0.014264739, %v3212_v49  ;;  %v3119_v28 = vadd.f32 -1.050512e-06, %v3113_v7 }
0x10b8   : > { %v3147_v37 = vmul.f32 %v3141_v10, %v5575_v38  ;;  %4754 = vrcp.f32 %v3219_v11  ;;  %v3197_v16 = vadd.f32 -0.001682827, %v3191_v9  ;;  %v3118_v3 = vadd.f32 -1.050512e-06, %v3112_v12 }
0x10b9   : > { %v3146_v1 = vmul.f32 %v3140_v63, %v5579_v2  ;;  %4756 = vrcp.f32 %v3218_v57  ;;  %v3125_v40 = vmul.f32 %v3119_v28, %v5605_v21  ;;  %v3184_v31 = vadd.f32 -0.00021337405, %v3178_v8 }
0x10ba   : > { %v3153_v51 = vadd.f32 -0.0014773, %v3147_v37  ;;  %v3203_v39 = vmul.f32 %v3197_v16, %v5605_v21  ;;  %v3124_v52 = vmul.f32 %v3118_v3, %v5612_v25  ;;  %v5633_v53 = vclamps-f32 %v3079_v22, 4.0 }
0x10bb   : > { %v3152_v54 = vadd.f32 -0.0014773, %v3146_v1  ;;  %v3131_v55 = vadd.f32 -2.8462531e-05, %v3125_v40  ;;  %v3190_v56 = vmul.f32 %v3184_v31, %v5612_v25  ;;  %v5636_v58 = vclamps-f32 %v3078_v27, 4.0 }
0x10bc   : > { %v3159_v59 = vmul.f32 %v3153_v51, %v5575_v38  ;;  %v3209_v60 = vadd.f32 -0.0073733293, %v3203_v39  ;;  %v3130_v13 = vadd.f32 -2.8462531e-05, %v3124_v52  ;;  %v5641_v14 = vmul.f32 %v5633_v53, %v5633_v53 }
0x10bd   : > { %v3158_v15 = vmul.f32 %v3152_v54, %v5579_v2  ;;  %v3137_v19 = vmul.f32 %v3131_v55, %v5605_v21  ;;  %v3196_v20 = vadd.f32 -0.001682827, %v3190_v56  ;;  %v5647_v22 = vmul.f32 %v5636_v58, %v5636_v58 }
0x10be   : > { %v3165_v23 = vadd.f32 -0.008048017, %v3159_v59  ;;  %v3215_v24 = vmul.f32 %v3209_v60, %v5605_v21  ;;  %v3136_v38 = vmul.f32 %v3130_v13, %v5612_v25  ;;  %v3103_v27 = vmul.f32 -1.3630712e-10, %v5641_v14 }
0x10bf   : > { %v3164_v33 = vadd.f32 -0.008048017, %v3158_v15  ;;  %v3143_v30 = vadd.f32 -0.00036749532, %v3137_v19  ;;  %v3202_v42 = vmul.f32 %v3196_v20, %v5612_v25  ;;  %v3181_v2 = vmul.f32 -1.45660715e-05, %v5641_v14 }
0x10c0   : > { %v3171_v44 = vmul.f32 %v5569_v0, %v3165_v23  ;;  %v3221_v6 = vadd.f32 -0.014264739, %v3215_v24  ;;  %v3142_v43 = vadd.f32 -0.00036749532, %v3136_v38  ;;  %v3109_v35 = vadd.f32 1.3853407e-08, %v3103_v27 }
0x10c1   : > { %v3170_v41 = vmul.f32 %v5571_v26, %v3164_v33  ;;  %v3149_v48 = vmul.f32 %v3143_v30, %v5605_v21  ;;  %v3208_v45 = vadd.f32 -0.0073733293, %v3202_v42  ;;  %v3187_v46 = vadd.f32 -0.00021337405, %v3181_v2 }
0x10c2   : > { %v4755_v5 = vpop.eup %4754  ;;  %4758 = vrcp.f32 %v3221_v6  ;;  %v3148_v4 = vmul.f32 %v3142_v43, %v5612_v25  ;;  %v3115_v47 = vmul.f32 %v3109_v35, %v5641_v14  ;;  %v3102_v50 = vmul.f32 -1.3630712e-10, %v5647_v22 }
0x10c3   : > { %v4757_v49 = vpop.eup %4756  ;;  %v3231_v7 = vmul.f32 %v4755_v5, %v3171_v44  ;;  %v3155_v0 = vadd.f32 -0.0014773, %v3149_v48  ;;  %v3214_v8 = vmul.f32 %v3208_v45, %v5612_v25  ;;  %v3193_v10 = vmul.f32 %v3187_v46, %v5641_v14 }
0x10c4   : > { %v3230_v26 = vmul.f32 %v4757_v49, %v3170_v41  ;;  %v3154_v11 = vadd.f32 -0.0014773, %v3148_v4  ;;  %v3121_v9 = vadd.f32 -1.050512e-06, %v3115_v47  ;;  %v3108_v12 = vadd.f32 1.3853407e-08, %v3102_v50 }
0x10c5   : > { %v3237_v63 = vadd.f32 0.5, %v3231_v7  ;;  %v3161_v57 = vmul.f32 %v3155_v0, %v5605_v21  ;;  %v3220_v28 = vadd.f32 -0.014264739, %v3214_v8  ;;  %v3199_v37 = vadd.f32 -0.001682827, %v3193_v10 }
0x10c6   : > { %v3236_v16 = vadd.f32 0.5, %v3230_v26  ;;  %v3160_v3 = vmul.f32 %v3154_v11, %v5612_v25  ;;  %v3127_v1 = vmul.f32 %v3121_v9, %v5641_v14  ;;  %v3114_v40 = vmul.f32 %v3108_v12, %v5647_v22 }
0x10c7   : > { %v3167_v31 = vadd.f32 -0.008048017, %v3161_v57  ;;  %4760 = vrcp.f32 %v3220_v28  ;;  %v3205_v51 = vmul.f32 %v3199_v37, %v5641_v14  ;;  %v3243_v21 = vmul.f32 %v3237_v63, %v5563_v36 }
0x10c8   : > { %v3242_v39 = vmul.f32 %v3236_v16, %v5565_v34  ;;  %v3133_v52 = vadd.f32 -2.8462531e-05, %v3127_v1  ;;  %v3120_v54 = vadd.f32 -1.050512e-06, %v3114_v40  ;;  %v3180_v56 = vmul.f32 -1.45660715e-05, %v5647_v22 }
0x10c9   : > { %v3211_v55 = vadd.f32 -0.0073733293, %v3205_v51  ;;  %v3166_v59 = vadd.f32 -0.008048017, %v3160_v3  ;;  %v3173_v13 = vmul.f32 %v5595_v61, %v3167_v31 }
0x10ca   : > { %v3139_v25 = vmul.f32 %v3133_v52, %v5641_v14  ;;  %v3126_v60 = vmul.f32 %v3120_v54, %v5647_v22  ;;  %4266 = vmatprep.mubr.msk.f32.mxu1 %vm3263_vm10, %v3242_v39  ;;  %v3186_v15 = vadd.f32 -0.00021337405, %v3180_v56  ;;  %v4826_v39 = vmov (!%p3849_p5), 0.0|0.0  }
0x10cb   : > { %4267 = vmatmul.mubr.msk.f32.vlgmr.msra.gmra.mrb[30].mxu1 %vm3263_vm10, %v3243_v21  ;;  %v3217_v20 = vmul.f32 %v3211_v55, %v5641_v14  ;;  %v3172_v24 = vmul.f32 %v5599_v17, %v3166_v59  ;;  %4465 = vmatprep.subr.bf16.mxu0 (!%p3849_p5), %v4826_v39  ;;  %v4828_v54 = vmov (!%p3849_p5), 0.0   ;;  %v3387_v55 = vld [vmem:[%s5817_s3] sm:$0x3] (!%p3849_p5) }
0x10cc   : > { %v4759_v34 = vpop.eup %4758  ;;  %v3145_v19 = vadd.f32 -0.00036749532, %v3139_v25  ;;  %v3132_v36 = vadd.f32 -2.8462531e-05, %v3126_v60  ;;  %v3192_v23 = vmul.f32 %v3186_v15, %v5647_v22  ;;  %4474 = vmatprep.subr.bf16.mxu1 (!%p3849_p5), %v4826_v39  ;;  %4287 = vmatprep.mubr.msk.f32.mxu0 (!%p3849_p5), %vm4827_vm11, %v4828_v54 }
0x10cd   : > { %v3233_v33 = vmul.f32 %v4759_v34, %v3173_v13  ;;  %v3223_v42 = vadd.f32 -0.014264739, %v3217_v20  ;;  %v3491_v20 = vld [vmem:[%s5779_s20] sm:$0xff] (!%p3849_p5) }
0x10ce   : > { %v3151_v38 = vmul.f32 %v3145_v19, %v5641_v14  ;;  %v3138_v27 = vmul.f32 %v3132_v36, %v5647_v22  ;;  %v3198_v30 = vadd.f32 -0.001682827, %v3192_v23  ;;  %v3492_v36 = vld [vmem:[%s5779_s20 + $0x8] sm:$0xff] (!%p3849_p5)  ;;  %v3493_v23 = vld [vmem:[%s5779_s20 + $0x10] sm:$0xff] (!%p3849_p5) }
0x10cf   : > { %v3239_v41 = vadd.f32 0.5, %v3233_v33  ;;  %4762 = vrcp.f32 %v3223_v42 }
0x10d0   : > { %v3144_v61 = vadd.f32 -0.00036749532, %v3138_v27  ;;  %v3157_v44 = vadd.f32 -0.0014773, %v3151_v38  ;;  %v3204_v6 = vmul.f32 %v3198_v30, %v5647_v22  ;;  %v3494_v38 = vld [vmem:[%s5779_s20 + $0x18] sm:$0xff] (!%p3849_p5) }
0x10d1   : > { %v4761_v2 = vpop.eup %4760  ;;  %v3245_v47 = vmul.f32 %v3239_v41, %v5585_v29  ;;  %v4478_v27 = vpack.c.bf16 (!%p3849_p5), %v3494_v38, %v3493_v23  ;;  %v3853_v41 = vld [vmem:[%s5820_s22] ss:$0 sm:$0xff] (!%p3849_p5) }
0x10d2   : > { %v3232_v43 = vmul.f32 %v4761_v2, %v3172_v24  ;;  %v3150_v35 = vmul.f32 %v3144_v61, %v5647_v22  ;;  %v3210_v48 = vadd.f32 -0.0073733293, %v3204_v6  ;;  %v3163_v46 = vmul.f32 %v3157_v44, %v5641_v14  ;;  %v3851_v2 = vld [vmem:[%s5818_s9] ss:$0 sm:$0xff] (!%p3849_p5) }
0x10d3   : > { %v4475_v24 = vpack.c.bf16 (!%p3849_p5), %v3492_v36, %v3491_v20  ;;  %v3852_v6 = vld [vmem:[%s5819_s29] ss:$0 sm:$0xff] (!%p3849_p5) }
0x10d4   : > { %v3238_v45 = vadd.f32 0.5, %v3232_v43  ;;  %v3156_v17 = vadd.f32 -0.0014773, %v3150_v35  ;;  %v3216_v5 = vmul.f32 %v3210_v48, %v5647_v22  ;;  %v3169_v7 = vadd.f32 -0.008048017, %v3163_v46 }
0x10d5   : > { %4476 = vmatpush3.bf16.msra.mxu1 (!%p3849_p5), %v4475_v24 }
0x10d6   : > { %v3244_v4 = vmul.f32 %v3238_v45, %v5587_v32  ;;  %v3222_v50 = vadd.f32 -0.014264739, %v3216_v5  ;;  %v3162_v49 = vmul.f32 %v3156_v17, %v5647_v22  ;;  %v3175_v8 = vmul.f32 %v5633_v53, %v3169_v7  ;;  %v3842_v53 = vld [vmem:[%s5816_s30] ss:$0 sm:$0xff]  ;;  %4477 = vmatprep.subr.bf16.mxu1 (!%p3849_p5), %v4826_v39 }
0x10d8   : > { %4269 = vmatprep.mubr.msk.f32.mxu1 %vm3263_vm10, %v3244_v4  ;;  %4764 = vrcp.f32 %v3222_v50  ;;  %v3168_v0 = vadd.f32 -0.008048017, %v3162_v49 }
0x10d9   : > { %4270 = vmatmul.mubr.msk.f32.gmra.mrb[32].mxu1 %vm3263_vm10, %v3245_v47  ;;  %v4763_v14 = vpop.eup %4762 }
0x10da   : > { %v3174_v10 = vmul.f32 %v5636_v58, %v3168_v0  ;;  %v3235_v26 = vmul.f32 %v4763_v14, %v3175_v8  ;;  %4479 = vmatpush3.bf16.msra.mxu1 (!%p3849_p5), %v4478_v27 }
0x10dc   : > { %v3241_v29 = vadd.f32 0.5, %v3235_v26 }
0x10de   : > { %v3247_v12 = vmul.f32 %v3241_v29, %v5597_v62 }
0x10e2   : > { %v4765_v32 = vpop.eup %4764 }
0x10e3   : > { %v3234_v11 = vmul.f32 %v4765_v32, %v3174_v10 }
0x10e5   : > { %v3240_v9 = vadd.f32 0.5, %v3234_v11 }
0x10e7   : > { %v3246_v22 = vmul.f32 %v3240_v9, %v5601_v18 }
0x10e9   : > { %4272 = vmatprep.mubr.msk.f32.mxu1 %vm3263_vm10, %v3246_v22 }
0x10ea   : > { %4273 = vmatmul.mubr.msk.f32.gmra.mrb[34].mxu1 %vm3263_vm10, %v3247_v12 }
0x10eb   : > { %4298 = vmatprep.mubr.msk.f32.mxu1 (!%p3849_p5), %vm4827_vm11, %v4828_v54 }
0x119e   : > { %v4268_v63 = vpop.f32.mrb[30].mxu1 }
0x119f   : > { %v3354_v58 = vadd.f32 %v4268_v63, %v3842_v53  ;;  %v3348_v57 = vpop.f32.mrb[31].mxu1 }
0x11a0   : > { %v3349_v28 = vadd.f32 %v3842_v53, %v3348_v57 }
0x11a1   : > { %3378 = vst.msk [vmem:[#allocation2 + $0x8] sm:$0xff] %vm999_vm4, %v3354_v58 }
0x11a2   : > { %3377 = vst.msk [vmem:[#allocation2] sm:$0xff] %vm999_vm4, %v3349_v28  ;;  %v4466_v51 = vpack.c.bf16 (!%p3849_p5), %v3354_v58, %v3349_v28 }
0x11a4   : > { %4467 = vmatpush3.bf16.msra.mxu0 (!%p3849_p5), %v4466_v51 }
0x11a5   : > { %4468 = vmatprep.subr.bf16.mxu0 (!%p3849_p5), %v4826_v39 }
0x11ac   : > { %v4271_v18 = vpop.f32.mrb[32].mxu1 }
0x11ad   : > { %v3364_v37 = vadd.f32 %v4271_v18, %v3842_v53  ;;  %v3358_v62 = vpop.f32.mrb[33].mxu1 }
0x11ae   : > { %v3359_v16 = vadd.f32 %v3842_v53, %v3358_v62 }
0x11af   : > { %3380 = vst.msk [vmem:[#allocation2 + $0x18] sm:$0xff] %vm999_vm4, %v3364_v37 }
0x11b0   : > { %3379 = vst.msk [vmem:[#allocation2 + $0x10] sm:$0xff] %vm999_vm4, %v3359_v16  ;;  %v4469_v52 = vpack.c.bf16 (!%p3849_p5), %v3364_v37, %v3359_v16 }
0x11b2   : > { %4470 = vmatpush3.bf16.msra.mxu0 (!%p3849_p5), %v4469_v52 }
0x11b3   : > { %4471 = vmatprep.subr.bf16.mxu0 (!%p3849_p5), %v4826_v39 }
0x11bb   : > { %3386 = sbr.rel (%p3849_p5) target bundleno = 5290 (0x14aa), region = 116 }
0x11bd   : > { %v4274_v3 = vpop.f32.mrb[34].mxu1 }
0x11be   : > { %v3374_v1 = vadd.f32 %v4274_v3, %v3842_v53  ;;  %v3368_v40 = vpop.f32.mrb[35].mxu1 }
0x11bf   : > { %v3369_v31 = vadd.f32 %v3842_v53, %v3368_v40 }
0x11c0   : > { %3382 = vst.msk [vmem:[#allocation2 + $0x28] sm:$0xff] %vm999_vm4, %v3374_v1 }
0x11c1   : > { %3381 = vst.msk [vmem:[#allocation2 + $0x20] sm:$0xff] %vm999_vm4, %v3369_v31  ;;  %v4472_v21 = vpack.c.bf16 (!%p3849_p5), %v3374_v1, %v3369_v31 }
0x11c3   : > { %4473 = vmatpush3.bf16.msra.mxu0 %v4472_v21 }
0x11c6   : > { %4288 = vmatmul.mubr.msk.f32.vlgmr.msra.gmra.mrb[0].mxu0 %vm1376_vm7, %v3387_v55 }
0x1299   : > { %v3457_v56 = vpop.f32.mrb[0].mxu0 }
0x129a   : > { %v4289_v59 = vpop.f32.mrb[1].mxu0  ;;  %v3464_v25 = vsel %vm3463_vm12, %v3457_v56, 0.0 }
0x129b   : > { %3465 = vadd.xlane.f32.xlu0 %v3464_v25 }
0x1328   : > { %v3466_v60 = vpop.xlane.xlu0 %3465 }
0x1329   : > { %v3467_v13 = vmul.f32 0.03125, %v3466_v60 }
0x132b   : > { %v3468_v15 = vsub.f32 %v3457_v56, %v3467_v13 }
0x132d   : > { %v3469_v34 = vmul.f32 %v3468_v15, %v3468_v15 }
0x132f   : > { %v3470_v19 = vsel %vm3463_vm12, %v3469_v34, 0.0 }
0x1330   : > { %3471 = vadd.xlane.f32.xlu0 %v3470_v19 }
0x13bd   : > { %v3472_v33 = vpop.xlane.xlu0 %3471 }
0x13be   : > { %v3473_v30 = vmul.f32 0.03125, %v3472_v33 }
0x13c0   : > { %v3474_v42 = vadd.f32 1e-05, %v3473_v30 }
0x13c2   : > { %4772 = vrsqrt.f32 %v3474_v42 }
0x13cc   : > { %v4773_v61 = vpop.eup %4772 }
0x13cd   : > { %v3476_v44 = vmul.f32 %v4773_v61, %v3468_v15 }
0x13cf   : > { %v3483_v43 = vmul.f32 %v3851_v2, %v3476_v44 }
0x13d1   : > { %v3490_v35 = vadd.f32 %v3852_v6, %v3483_v43 }
0x13d3   : > { %4299 = vmatmul.mubr.msk.f32.vlgmr.msra.gmra.mrb[0].mxu1 %vm999_vm4, %v3490_v35 }
0x14a6   : > { %v3571_v48 = vpop.f32.mrb[0].mxu1 }
0x14a7   : > { %v3572_v45 = vadd.f32 %v3853_v41, %v3571_v48  ;;  %v4300_v17 = vpop.f32.mrb[1].mxu1 }
0x14a9   : > { %3576 = vst.msk [vmem:[#allocation3] sm:$0x3] %vm3575_vm13, %v3572_v45 }
0x14aa PF: > { %p4486_p6 = scmp.eq.s32.totalorder %s4951_s28, 1  ;;  %s4829_s4 = smov [#allocation3]  }
0x14ab   : > { %s3584_s21 = sshll.u32 %s4829_s4, 4  ;;  %s3585_s21 = int_to_ptr.vmem [resolvable:$true] %s3584_s21 }
0x14ac   : > { %s4774_s26 = scalar_lea.vmem %s3585_s21, 32  ;;  %p4781_p10 = scmp.lt.s32.totalorder %s3585_s21, %s3585_s21 }
0x14ad   : > { %p4775_p7 = scmp.ne.s32.totalorder %s3585_s21, %s4774_s26  ;;  %p4782_p11 = scmp.lt.s32.totalorder %s4774_s26, %s4774_s26 }
0x14af   : > { %p4776_p8 = pnand %p4775_p7, %p4486_p6  ;;  %p4783_p12 = por %p4782_p11, %p4781_p10 }
0x14b1   : > { %p4777_p9 = pneg %p4776_p8 }
0x14b3   : > { %p4784_p13 = pnand %p4783_p12, %p4777_p9 }
0x14b5   : > { %4787 = shalt.err (!%p4784_p13)
}
0x14b6   : > { %s5821_s24 = sld [smem:[#allocation19_spill]] }
0x14bc   : > { %s4788_s25 = scalar_lea.hbm %s5821_s24, 32 }
0x14bd   : > { %p4789_p0 = scmp.ne.s32.totalorder %s5821_s24, %s4788_s25  ;;  %p4794_p3 = scmp.lt.u32.totalorder %s4788_s25, %s5821_s24 }
0x14bf   : > { %p4790_p1 = pnand %p4789_p0, %p4486_p6 }
0x14c1   : > { %p4791_p2 = pneg %p4790_p1 }
0x14c3   : > { %p4796_p4 = pnand %p4794_p3, %p4791_p2 }
0x14c5   : > { %4799 = shalt.err (!%p4796_p4)
}
0x14c6   : > { %4483 = dma.vmem_to_hbm [thread:$0]  (%p4486_p6), %s3585_s21, 32, %s5821_s24, [#allocation4]  }
0x14c7   : > { %4805 = dma.done.wait (%p4486_p6), [#allocation4], 32  }
0x14c8   : > { %4807 = vsyncadd (%p4486_p6), [#allocation4], 4294967264 }
0x14c9 PF: > { %s5822_s27 = sld [smem:[#allocation6_spill]] }
0x14cf   : > { %s33_s3 = sadd.s32 1, %s5822_s27  }
0x14d0   : > { %p30_p5 = scmp.ge.s32.totalorder %s33_s3, 4  }
0x14d2   :  { %32 = sbr.rel (!%p30_p5) target bundleno = 15 (0xf), region = 173 }
0x14d9   :  { %3597 = vsyncpa [#allocation4], 1 }
0x14da   :  { %3599 = vsyncpa [#allocation4 + $0x1], 1 }

</bundles_post_ra>
